<compile_context>
chip_gen: v5e
topology: v5e:2x2
jax: 0.10.0
libtpu: 0.0.40
codegen_flags: <defaults>
</compile_context>

<pallas_src>
import math
import numpy as np
import jax
import jax.numpy as jnp
from jax.experimental import pallas as pl
from jax.experimental.pallas import tpu as pltpu

# ----------------------------- config ---------------------------------------
D_MODEL = 32      # decoder_hidden_dim
NHEAD   = 4
D_FF    = 64      # dim_feedforward
T_LEN   = 8       # target sequence length
S_LEN   = 16      # memory sequence length
BATCH   = 2
LEAKY_SLOPE = 0.01
LN_EPS = 1e-5

_HAS_PL_RECIP = hasattr(pl, "reciprocal")


# --------------------------- host-side param packing -------------------------
def pack_params(params):
    """Pack the 18 small parameter arrays into 2 slabs (done once, amortized).

    wslab : (224, 64) bf16   row-band layout, all weights pre-transposed:
        rows   0: 32  [Wq_sa^T * scale | Wk_sa^T]   (fused self-attn QK)
        rows  32: 64  [Wv_sa^T         | Wo_sa^T]
        rows  64: 96  [Wq_ca^T * scale | Wk_ca^T]
        rows  96:128  [Wv_ca^T         | Wo_ca^T]
        rows 128:160  W1^T  (linear1, genuinely 64 wide)
        rows 160:224  W2^T  (linear2, padded 32 -> 64 lanes)
    vslab : (16, 64)  f32    one bias / LN vector per row (zero-padded).
    The 1/sqrt(head_dim) query scaling is folded into the Q weights & biases.
    """
    D, F = D_MODEL, D_FF
    hd = D // NHEAD
    scale = 1.0 / math.sqrt(hd)
    W = max(2 * D, F)   # 64

    sa_in_w = params["sa_in_w"]                     # (3D, D)
    wq, wk, wv = sa_in_w[:D], sa_in_w[D:2 * D], sa_in_w[2 * D:]
    ca_in_w = params["ca_in_w"]
    cq, ck, cv = ca_in_w[:D], ca_in_w[D:2 * D], ca_in_w[2 * D:]

    band_a = jnp.concatenate([wq.T * scale, wk.T], axis=1)           # (32, 64)
    band_b = jnp.concatenate([wv.T, params["sa_out_w"].T], axis=1)   # (32, 64)
    band_c = jnp.concatenate([cq.T * scale, ck.T], axis=1)           # (32, 64)
    band_d = jnp.concatenate([cv.T, params["ca_out_w"].T], axis=1)   # (32, 64)
    band_e = params["l1_w"].T                                        # (32, 64)
    band_f = jnp.pad(params["l2_w"].T, ((0, 0), (0, W - D)))         # (64, 64)
    wslab = jnp.concatenate(
        [band_a, band_b, band_c, band_d, band_e, band_f], axis=0
    ).astype(jnp.bfloat16)                                           # (224, 64)

    sa_in_b = jnp.reshape(params["sa_in_b"], (-1,))
    ca_in_b = jnp.reshape(params["ca_in_b"], (-1,))
    bq, bk, bv = sa_in_b[:D], sa_in_b[D:2 * D], sa_in_b[2 * D:]
    cbq, cbk, cbv = ca_in_b[:D], ca_in_b[D:2 * D], ca_in_b[2 * D:]

    def vrow(x):
        x = jnp.reshape(x, (1, -1))
        return jnp.pad(x, ((0, 0), (0, W - x.shape[1])))

    vslab = jnp.concatenate([
        vrow(jnp.concatenate([bq * scale, bk])),   # row 0  : sa QK bias (fused, scaled)
        vrow(bv),                                  # row 1  : sa V bias
        vrow(params["sa_out_b"]),                  # row 2  : sa out bias
        vrow(cbq * scale),                         # row 3  : ca Q bias (scaled)
        vrow(cbk),                                 # row 4  : ca K bias
        vrow(cbv),                                 # row 5  : ca V bias
        vrow(params["ca_out_b"]),                  # row 6  : ca out bias
        vrow(params["l1_b"]),                      # row 7  : linear1 bias
        vrow(params["l2_b"]),                      # row 8  : linear2 bias
        vrow(params["ln1_w"]), vrow(params["ln1_b"]),   # rows 9,10
        vrow(params["ln2_w"]), vrow(params["ln2_b"]),   # rows 11,12
        vrow(params["ln3_w"]), vrow(params["ln3_b"]),   # rows 13,14
        jnp.zeros((1, W), jnp.float32),                 # row 15 (pad)
    ], axis=0).astype(jnp.float32)

    return wslab, vslab


# ------------------------------- kernel --------------------------------------
def make_kernel(T, S, D, F, H):
    hd = D // H
    f32 = jnp.float32
    bf = jnp.bfloat16

    def kernel(tgt_ref, mem_ref, qpos_ref, pos_ref, w_ref, v_ref, out_ref):
        # Per-batch blocks (leading batch dim of size 1).
        tgt = tgt_ref[0]        # (T, D) f32
        mem = mem_ref[0]        # (S, D) f32
        qpos = qpos_ref[0]      # (T, D) f32
        pos = pos_ref[0]        # (S, D) f32

        def vec(r, width):      # (1, width) bias / LN row, f32
            return v_ref[r:r + 1, 0:width]

        def layernorm(x, g_row, b_row):
            # Two independent reductions (overlap on the XLU); var = E[x^2]-mu^2.
            # NOTE: this form can cancel catastrophically for |mean| >> spread;
            # fine at these activation magnitudes.
            g = vec(g_row, D)
            b = vec(b_row, D)
            s1 = jnp.sum(x, axis=-1, keepdims=True)
            s2 = jnp.sum(x * x, axis=-1, keepdims=True)
            mu = s1 * (1.0 / D)
            var = s2 * (1.0 / D) - mu * mu
            return (x - mu) * jax.lax.rsqrt(var + LN_EPS) * g + b

        def softmax(s):
            m = jnp.max(s, axis=-1, keepdims=True)
            e = jnp.exp(s - m)
            denom = jnp.sum(e, axis=-1, keepdims=True)
            if _HAS_PL_RECIP:
                return e * pl.reciprocal(denom, approx=True)
            return e / denom

        def heads_attn(q, k, v, woT):
            # q: (T, D) f32; k, v: (R, D) f32; woT: (D, D) bf16.
            # Output projection folded into the head loop (no concatenate);
            # MXU operands in bf16, accumulation in f32.
            q16, k16, v16 = q.astype(bf), k.astype(bf), v.astype(bf)
            acc = None
            for h in range(H):                       # static unroll, H = 4
                sl = slice(h * hd, (h + 1) * hd)
                s = jax.lax.dot_general(
                    q16[:, sl], k16[:, sl],
                    dimension_numbers=(((1,), (1,)), ((), ())),
                    preferred_element_type=f32)                      # (T, R)
                p = softmax(s)                                       # f32
                o = jnp.dot(p.astype(bf), v16[:, sl],
                            preferred_element_type=f32)              # (T, hd)
                c = jnp.dot(o.astype(bf), woT[sl, :],
                            preferred_element_type=f32)              # (T, D)
                acc = c if acc is None else acc + c
            return acc

        # ---- self-attention block (pre-norm) ----
        x = layernorm(tgt, 9, 10)
        qk_in = (x + qpos).astype(bf)
        qk = jnp.dot(qk_in, w_ref[0:D, 0:2 * D],
                     preferred_element_type=f32) + vec(0, 2 * D)     # fused Q|K
        q = qk[:, 0:D]
        k = qk[:, D:2 * D]
        band_b = w_ref[D:2 * D, 0:2 * D]                             # [Wv^T | Wo^T] bf16
        vv = jnp.dot(x.astype(bf), band_b[:, 0:D],
                     preferred_element_type=f32) + vec(1, D)
        sa = heads_attn(q, k, vv, band_b[:, D:2 * D]) + vec(2, D)
        tgt = tgt + sa                                   # dropout1 = identity

        # ---- cross-attention block (pre-norm) ----
        x = layernorm(tgt, 11, 12)
        band_c = w_ref[2 * D:3 * D, 0:2 * D]                         # [Wq^T*s | Wk^T]
        band_d = w_ref[3 * D:4 * D, 0:2 * D]                         # [Wv^T   | Wo^T]
        q = jnp.dot((x + qpos).astype(bf), band_c[:, 0:D],
                    preferred_element_type=f32) + vec(3, D)
        k = jnp.dot((mem + pos).astype(bf), band_c[:, D:2 * D],
                    preferred_element_type=f32) + vec(4, D)
        vv = jnp.dot(mem.astype(bf), band_d[:, 0:D],
                     preferred_element_type=f32) + vec(5, D)
        ca = heads_attn(q, k, vv, band_d[:, D:2 * D]) + vec(6, D)
        tgt = tgt + ca                                   # dropout2 = identity

        # ---- feed-forward block (pre-norm, leaky_relu) ----
        x = layernorm(tgt, 13, 14)
        hid = jnp.dot(x.astype(bf), w_ref[4 * D:5 * D, 0:F],
                      preferred_element_type=f32) + vec(7, F)
        hid = jnp.where(hid >= 0.0, hid, LEAKY_SLOPE * hid)
        ff = jnp.dot(hid.astype(bf), w_ref[5 * D:5 * D + F, 0:D],
                     preferred_element_type=f32) + vec(8, D)
        out_ref[0] = tgt + ff                            # dropout3 = identity

    return kernel


# ------------------------------- wrapper --------------------------------------
def transformer_decoder_layer(tgt, memory, query_pos, pos, wslab, vslab):
    """tgt/query_pos: (B, T, D); memory/pos: (B, S, D). Returns (B, T, D)."""
    B, T, D = tgt.shape
    S = memory.shape[1]

    kernel = make_kernel(T, S, D, D_FF, NHEAD)

    out = pl.pallas_call(
        kernel,
        out_shape=jax.ShapeDtypeStruct((B, T, D), jnp.float32),
        grid=(B,),   # one batch per program; parallel -> second TC on v7x
        in_specs=[
            pl.BlockSpec((1, T, D), lambda b: (b, 0, 0)),   # tgt
            pl.BlockSpec((1, S, D), lambda b: (b, 0, 0)),   # memory
            pl.BlockSpec((1, T, D), lambda b: (b, 0, 0)),   # query_pos
            pl.BlockSpec((1, S, D), lambda b: (b, 0, 0)),   # pos
            pl.BlockSpec(wslab.shape, lambda b: (0, 0)),    # weight slab (constant block)
            pl.BlockSpec(vslab.shape, lambda b: (0, 0)),    # bias / LN slab
        ],
        out_specs=pl.BlockSpec((1, T, D), lambda b: (b, 0, 0)),
        compiler_params=pltpu.CompilerParams(
            dimension_semantics=("parallel",)),
    )(tgt, memory, query_pos, pos, wslab, vslab)
    return out


# --------------------------- pure-JAX reference -------------------------------
def _ref_single(tgt, mem, qpos, pos, p):
    def ln(x, g, b):
        mu = x.mean(-1, keepdims=True)
        var = ((x - mu) ** 2).mean(-1, keepdims=True)
        return (x - mu) / jnp.sqrt(var + LN_EPS) * g[0] + b[0]

    def mha(q_in, k_in, v_in, in_w, in_b, out_w, out_b):
        d = q_in.shape[-1]
        hd = d // NHEAD
        q = q_in @ in_w[:d].T + in_b[0, :d]
        k = k_in @ in_w[d:2 * d].T + in_b[0, d:2 * d]
        v = v_in @ in_w[2 * d:].T + in_b[0, 2 * d:]
        outs = []
        for h in range(NHEAD):
            qh = q[:, h * hd:(h + 1) * hd] / math.sqrt(hd)
            kh = k[:, h * hd:(h + 1) * hd]
            vh = v[:, h * hd:(h + 1) * hd]
            s = qh @ kh.T
            pr = jax.nn.softmax(s, axis=-1)
            outs.append(pr @ vh)
        return jnp.concatenate(outs, -1) @ out_w.T + out_b[0]

    t2 = ln(tgt, p["ln1_w"], p["ln1_b"])
    qk = t2 + qpos
    tgt = tgt + mha(qk, qk, t2, p["sa_in_w"], p["sa_in_b"], p["sa_out_w"], p["sa_out_b"])
    t2 = ln(tgt, p["ln2_w"], p["ln2_b"])
    tgt = tgt + mha(t2 + qpos, mem + pos, mem,
                    p["ca_in_w"], p["ca_in_b"], p["ca_out_w"], p["ca_out_b"])
    t2 = ln(tgt, p["ln3_w"], p["ln3_b"])
    h = t2 @ p["l1_w"].T + p["l1_b"][0]
    h = jnp.where(h >= 0, h, LEAKY_SLOPE * h)
    tgt = tgt + (h @ p["l2_w"].T + p["l2_b"][0])
    return tgt


# --------------------------------- main ---------------------------------------
if __name__ == "__main__":
    key = jax.random.PRNGKey(0)
    keys = jax.random.split(key, 32)
    ki = iter(keys)

    def rnd(shape, scale=0.1):
        return (scale * jax.random.normal(next(ki), shape)).astype(jnp.float32)

    D, F = D_MODEL, D_FF
    params = {
        "sa_in_w": rnd((3 * D, D)), "sa_in_b": rnd((1, 3 * D)),
        "sa_out_w": rnd((D, D)),    "sa_out_b": rnd((1, D)),
        "ca_in_w": rnd((3 * D, D)), "ca_in_b": rnd((1, 3 * D)),
        "ca_out_w": rnd((D, D)),    "ca_out_b": rnd((1, D)),
        "l1_w": rnd((F, D)), "l1_b": rnd((1, F)),
        "l2_w": rnd((D, F)), "l2_b": rnd((1, D)),
        "ln1_w": jnp.ones((1, D), jnp.float32), "ln1_b": jnp.zeros((1, D), jnp.float32),
        "ln2_w": jnp.ones((1, D), jnp.float32), "ln2_b": jnp.zeros((1, D), jnp.float32),
        "ln3_w": jnp.ones((1, D), jnp.float32), "ln3_b": jnp.zeros((1, D), jnp.float32),
    }

    tgt = rnd((BATCH, T_LEN, D), 1.0)
    memory = rnd((BATCH, S_LEN, D), 1.0)
    query_pos = rnd((BATCH, T_LEN, D), 1.0)
    pos = rnd((BATCH, S_LEN, D), 1.0)

    # One-time (amortizable) packing of all weights into two slabs.
    wslab, vslab = pack_params(params)
    wslab = jax.block_until_ready(wslab)
    vslab = jax.block_until_ready(vslab)

    out = transformer_decoder_layer(tgt, memory, query_pos, pos, wslab, vslab)
    out = jax.block_until_ready(out)

    ref = jax.vmap(lambda t, m, qp, po: _ref_single(t, m, qp, po, params))(
        tgt, memory, query_pos, pos)
    ref = jax.block_until_ready(ref)

    assert out.shape == (BATCH, T_LEN, D_MODEL)
    # Tolerance loosened vs. exact f32: bf16 MXU operands + EUP approximate
    # reciprocal in the softmax denominator (accumulation stays f32).
    np.testing.assert_allclose(np.asarray(out), np.asarray(ref), rtol=2e-2, atol=2e-2)
    print("KERNEL_OK")
</pallas_src>

<mosaic_0001>
module attributes {stable_mosaic.version = 11 : i64} {
  func.func @kernel(%arg0: i32, %arg1: memref<1x8x32xf32, #tpu.memory_space<vmem>>, %arg2: memref<1x16x32xf32, #tpu.memory_space<vmem>>, %arg3: memref<1x8x32xf32, #tpu.memory_space<vmem>>, %arg4: memref<1x16x32xf32, #tpu.memory_space<vmem>>, %arg5: memref<224x64xbf16, #tpu.memory_space<vmem>>, %arg6: memref<16x64xf32, #tpu.memory_space<vmem>>, %arg7: memref<1x8x32xf32, #tpu.memory_space<vmem>>) attributes {dimension_semantics = [#tpu.dimension_semantics<parallel>], iteration_bounds = array<i64: 2>, scalar_prefetch = 0 : i64, scratch_operands = 0 : i64, tpu.core_type = #tpu.core_type<tc>, window_params = [{transform_indices = @transform_0, window_bounds = array<i64: 1, 8, 32>}, {transform_indices = @transform_1, window_bounds = array<i64: 1, 16, 32>}, {transform_indices = @transform_2, window_bounds = array<i64: 1, 8, 32>}, {transform_indices = @transform_3, window_bounds = array<i64: 1, 16, 32>}, {pipeline_mode = #tpu.pipeline_mode<synchronous>, transform_indices = @transform_4, window_bounds = array<i64: 224, 64>}, {pipeline_mode = #tpu.pipeline_mode<synchronous>, transform_indices = @transform_5, window_bounds = array<i64: 16, 64>}, {transform_indices = @transform_6, window_bounds = array<i64: 1, 8, 32>}]} {
    %c0 = arith.constant 0 : index
    %c0_0 = arith.constant 0 : index
    %c0_1 = arith.constant 0 : index
    %0 = vector.load %arg1[%c0, %c0_0, %c0_1] : memref<1x8x32xf32, #tpu.memory_space<vmem>>, vector<1x8x32xf32>
    %1 = vector.shape_cast %0 : vector<1x8x32xf32> to vector<8x32xf32>
    %c0_2 = arith.constant 0 : index
    %c0_3 = arith.constant 0 : index
    %c0_4 = arith.constant 0 : index
    %2 = vector.load %arg2[%c0_2, %c0_3, %c0_4] : memref<1x16x32xf32, #tpu.memory_space<vmem>>, vector<1x16x32xf32>
    %3 = vector.shape_cast %2 : vector<1x16x32xf32> to vector<16x32xf32>
    %c0_5 = arith.constant 0 : index
    %c0_6 = arith.constant 0 : index
    %c0_7 = arith.constant 0 : index
    %4 = vector.load %arg3[%c0_5, %c0_6, %c0_7] : memref<1x8x32xf32, #tpu.memory_space<vmem>>, vector<1x8x32xf32>
    %5 = vector.shape_cast %4 : vector<1x8x32xf32> to vector<8x32xf32>
    %c0_8 = arith.constant 0 : index
    %c0_9 = arith.constant 0 : index
    %c0_10 = arith.constant 0 : index
    %6 = vector.load %arg4[%c0_8, %c0_9, %c0_10] : memref<1x16x32xf32, #tpu.memory_space<vmem>>, vector<1x16x32xf32>
    %7 = vector.shape_cast %6 : vector<1x16x32xf32> to vector<16x32xf32>
    %c9 = arith.constant 9 : index
    %c0_11 = arith.constant 0 : index
    %8 = vector.load %arg6[%c9, %c0_11] : memref<16x64xf32, #tpu.memory_space<vmem>>, vector<1x32xf32>
    %c10 = arith.constant 10 : index
    %c0_12 = arith.constant 0 : index
    %9 = vector.load %arg6[%c10, %c0_12] : memref<16x64xf32, #tpu.memory_space<vmem>>, vector<1x32xf32>
    %cst = arith.constant dense<0.000000e+00> : vector<8xf32>
    %10 = vector.multi_reduction <add>, %1, %cst [1] : vector<8x32xf32> to vector<8xf32>
    %11 = vector.shape_cast %10 : vector<8xf32> to vector<8x1xf32>
    %12 = arith.mulf %1, %1 : vector<8x32xf32>
    %cst_13 = arith.constant dense<0.000000e+00> : vector<8xf32>
    %13 = vector.multi_reduction <add>, %12, %cst_13 [1] : vector<8x32xf32> to vector<8xf32>
    %14 = vector.shape_cast %13 : vector<8xf32> to vector<8x1xf32>
    %cst_14 = arith.constant 3.125000e-02 : f32
    %15 = vector.broadcast %cst_14 : f32 to vector<8x1xf32>
    %16 = arith.mulf %11, %15 : vector<8x1xf32>
    %cst_15 = arith.constant 3.125000e-02 : f32
    %17 = vector.broadcast %cst_15 : f32 to vector<8x1xf32>
    %18 = arith.mulf %14, %17 : vector<8x1xf32>
    %19 = arith.mulf %16, %16 : vector<8x1xf32>
    %20 = arith.subf %18, %19 : vector<8x1xf32>
    %21 = vector.broadcast %16 : vector<8x1xf32> to vector<8x32xf32>
    %22 = arith.subf %1, %21 : vector<8x32xf32>
    %cst_16 = arith.constant 9.99999974E-6 : f32
    %23 = vector.broadcast %cst_16 : f32 to vector<8x1xf32>
    %24 = arith.addf %20, %23 : vector<8x1xf32>
    %25 = math.rsqrt %24 : vector<8x1xf32>
    %26 = vector.broadcast %25 : vector<8x1xf32> to vector<8x32xf32>
    %27 = arith.mulf %22, %26 : vector<8x32xf32>
    %28 = vector.broadcast %8 : vector<1x32xf32> to vector<8x32xf32>
    %29 = arith.mulf %27, %28 : vector<8x32xf32>
    %30 = vector.broadcast %9 : vector<1x32xf32> to vector<8x32xf32>
    %31 = arith.addf %29, %30 : vector<8x32xf32>
    %32 = arith.addf %31, %5 : vector<8x32xf32>
    %33 = arith.truncf %32 : vector<8x32xf32> to vector<8x32xbf16>
    %c0_17 = arith.constant 0 : index
    %c0_18 = arith.constant 0 : index
    %34 = vector.load %arg5[%c0_17, %c0_18] : memref<224x64xbf16, #tpu.memory_space<vmem>>, vector<32x64xbf16>
    %cst_19 = arith.constant dense<0.000000e+00> : vector<8x64xf32>
    %35 = tpu.matmul %33, %34, %cst_19 {dimension_numbers = #tpu.dot_dimension_numbers<[1], [0], [0], [1], [0, 0, 1, 1], [], []>} : vector<8x32xbf16>, vector<32x64xbf16>, vector<8x64xf32> -> vector<8x64xf32>
    %c0_20 = arith.constant 0 : index
    %c0_21 = arith.constant 0 : index
    %36 = vector.load %arg6[%c0_20, %c0_21] : memref<16x64xf32, #tpu.memory_space<vmem>>, vector<1x64xf32>
    %37 = vector.broadcast %36 : vector<1x64xf32> to vector<8x64xf32>
    %38 = arith.addf %35, %37 : vector<8x64xf32>
    %39 = vector.extract_strided_slice %38 {offsets = [0, 0], sizes = [8, 32], strides = [1, 1]} : vector<8x64xf32> to vector<8x32xf32>
    %40 = vector.extract_strided_slice %38 {offsets = [0, 32], sizes = [8, 32], strides = [1, 1]} : vector<8x64xf32> to vector<8x32xf32>
    %c32 = arith.constant 32 : index
    %c0_22 = arith.constant 0 : index
    %41 = vector.load %arg5[%c32, %c0_22] : memref<224x64xbf16, #tpu.memory_space<vmem>>, vector<32x64xbf16>
    %42 = arith.truncf %31 : vector<8x32xf32> to vector<8x32xbf16>
    %43 = vector.extract_strided_slice %41 {offsets = [0, 0], sizes = [32, 32], strides = [1, 1]} : vector<32x64xbf16> to vector<32x32xbf16>
    %cst_23 = arith.constant dense<0.000000e+00> : vector<8x32xf32>
    %44 = tpu.matmul %42, %43, %cst_23 {dimension_numbers = #tpu.dot_dimension_numbers<[1], [0], [0], [1], [0, 0, 1, 1], [], []>} : vector<8x32xbf16>, vector<32x32xbf16>, vector<8x32xf32> -> vector<8x32xf32>
    %c1 = arith.constant 1 : index
    %c0_24 = arith.constant 0 : index
    %45 = vector.load %arg6[%c1, %c0_24] : memref<16x64xf32, #tpu.memory_space<vmem>>, vector<1x32xf32>
    %46 = vector.broadcast %45 : vector<1x32xf32> to vector<8x32xf32>
    %47 = arith.addf %44, %46 : vector<8x32xf32>
    %48 = vector.extract_strided_slice %41 {offsets = [0, 32], sizes = [32, 32], strides = [1, 1]} : vector<32x64xbf16> to vector<32x32xbf16>
    %49 = arith.truncf %39 : vector<8x32xf32> to vector<8x32xbf16>
    %50 = arith.truncf %40 : vector<8x32xf32> to vector<8x32xbf16>
    %51 = arith.truncf %47 : vector<8x32xf32> to vector<8x32xbf16>
    %52 = vector.extract_strided_slice %49 {offsets = [0, 0], sizes = [8, 8], strides = [1, 1]} : vector<8x32xbf16> to vector<8x8xbf16>
    %53 = vector.extract_strided_slice %50 {offsets = [0, 0], sizes = [8, 8], strides = [1, 1]} : vector<8x32xbf16> to vector<8x8xbf16>
    %cst_25 = arith.constant dense<0.000000e+00> : vector<8x8xf32>
    %54 = tpu.matmul %52, %53, %cst_25 {dimension_numbers = #tpu.dot_dimension_numbers<[1], [1], [0], [0], [0, 0, 1, 0], [], []>} : vector<8x8xbf16>, vector<8x8xbf16>, vector<8x8xf32> -> vector<8x8xf32>
    %cst_26 = arith.constant dense<0xFF800000> : vector<8xf32>
    %55 = vector.multi_reduction <maximumf>, %54, %cst_26 [1] : vector<8x8xf32> to vector<8xf32>
    %56 = vector.shape_cast %55 : vector<8xf32> to vector<8x1xf32>
    %57 = vector.broadcast %56 : vector<8x1xf32> to vector<8x8xf32>
    %58 = arith.subf %54, %57 : vector<8x8xf32>
    %59 = math.exp %58 : vector<8x8xf32>
    %cst_27 = arith.constant dense<0.000000e+00> : vector<8xf32>
    %60 = vector.multi_reduction <add>, %59, %cst_27 [1] : vector<8x8xf32> to vector<8xf32>
    %61 = vector.shape_cast %60 : vector<8xf32> to vector<8x1xf32>
    %62 = tpu.reciprocal %61 {approx = true} : vector<8x1xf32> -> vector<8x1xf32>
    %63 = vector.broadcast %62 : vector<8x1xf32> to vector<8x8xf32>
    %64 = arith.mulf %59, %63 : vector<8x8xf32>
    %65 = arith.truncf %64 : vector<8x8xf32> to vector<8x8xbf16>
    %66 = vector.extract_strided_slice %51 {offsets = [0, 0], sizes = [8, 8], strides = [1, 1]} : vector<8x32xbf16> to vector<8x8xbf16>
    %cst_28 = arith.constant dense<0.000000e+00> : vector<8x8xf32>
    %67 = tpu.matmul %65, %66, %cst_28 {dimension_numbers = #tpu.dot_dimension_numbers<[1], [0], [0], [1], [0, 0, 1, 1], [], []>} : vector<8x8xbf16>, vector<8x8xbf16>, vector<8x8xf32> -> vector<8x8xf32>
    %68 = arith.truncf %67 : vector<8x8xf32> to vector<8x8xbf16>
    %69 = vector.extract_strided_slice %48 {offsets = [0, 0], sizes = [8, 32], strides = [1, 1]} : vector<32x32xbf16> to vector<8x32xbf16>
    %cst_29 = arith.constant dense<0.000000e+00> : vector<8x32xf32>
    %70 = tpu.matmul %68, %69, %cst_29 {dimension_numbers = #tpu.dot_dimension_numbers<[1], [0], [0], [1], [0, 0, 1, 1], [], []>} : vector<8x8xbf16>, vector<8x32xbf16>, vector<8x32xf32> -> vector<8x32xf32>
    %71 = vector.extract_strided_slice %49 {offsets = [0, 8], sizes = [8, 8], strides = [1, 1]} : vector<8x32xbf16> to vector<8x8xbf16>
    %72 = vector.extract_strided_slice %50 {offsets = [0, 8], sizes = [8, 8], strides = [1, 1]} : vector<8x32xbf16> to vector<8x8xbf16>
    %cst_30 = arith.constant dense<0.000000e+00> : vector<8x8xf32>
    %73 = tpu.matmul %71, %72, %cst_30 {dimension_numbers = #tpu.dot_dimension_numbers<[1], [1], [0], [0], [0, 0, 1, 0], [], []>} : vector<8x8xbf16>, vector<8x8xbf16>, vector<8x8xf32> -> vector<8x8xf32>
    %cst_31 = arith.constant dense<0xFF800000> : vector<8xf32>
    %74 = vector.multi_reduction <maximumf>, %73, %cst_31 [1] : vector<8x8xf32> to vector<8xf32>
    %75 = vector.shape_cast %74 : vector<8xf32> to vector<8x1xf32>
    %76 = vector.broadcast %75 : vector<8x1xf32> to vector<8x8xf32>
    %77 = arith.subf %73, %76 : vector<8x8xf32>
    %78 = math.exp %77 : vector<8x8xf32>
    %cst_32 = arith.constant dense<0.000000e+00> : vector<8xf32>
    %79 = vector.multi_reduction <add>, %78, %cst_32 [1] : vector<8x8xf32> to vector<8xf32>
    %80 = vector.shape_cast %79 : vector<8xf32> to vector<8x1xf32>
    %81 = tpu.reciprocal %80 {approx = true} : vector<8x1xf32> -> vector<8x1xf32>
    %82 = vector.broadcast %81 : vector<8x1xf32> to vector<8x8xf32>
    %83 = arith.mulf %78, %82 : vector<8x8xf32>
    %84 = arith.truncf %83 : vector<8x8xf32> to vector<8x8xbf16>
    %85 = vector.extract_strided_slice %51 {offsets = [0, 8], sizes = [8, 8], strides = [1, 1]} : vector<8x32xbf16> to vector<8x8xbf16>
    %cst_33 = arith.constant dense<0.000000e+00> : vector<8x8xf32>
    %86 = tpu.matmul %84, %85, %cst_33 {dimension_numbers = #tpu.dot_dimension_numbers<[1], [0], [0], [1], [0, 0, 1, 1], [], []>} : vector<8x8xbf16>, vector<8x8xbf16>, vector<8x8xf32> -> vector<8x8xf32>
    %87 = arith.truncf %86 : vector<8x8xf32> to vector<8x8xbf16>
    %88 = vector.extract_strided_slice %48 {offsets = [8, 0], sizes = [8, 32], strides = [1, 1]} : vector<32x32xbf16> to vector<8x32xbf16>
    %cst_34 = arith.constant dense<0.000000e+00> : vector<8x32xf32>
    %89 = tpu.matmul %87, %88, %cst_34 {dimension_numbers = #tpu.dot_dimension_numbers<[1], [0], [0], [1], [0, 0, 1, 1], [], []>} : vector<8x8xbf16>, vector<8x32xbf16>, vector<8x32xf32> -> vector<8x32xf32>
    %90 = arith.addf %70, %89 : vector<8x32xf32>
    %91 = vector.extract_strided_slice %49 {offsets = [0, 16], sizes = [8, 8], strides = [1, 1]} : vector<8x32xbf16> to vector<8x8xbf16>
    %92 = vector.extract_strided_slice %50 {offsets = [0, 16], sizes = [8, 8], strides = [1, 1]} : vector<8x32xbf16> to vector<8x8xbf16>
    %cst_35 = arith.constant dense<0.000000e+00> : vector<8x8xf32>
    %93 = tpu.matmul %91, %92, %cst_35 {dimension_numbers = #tpu.dot_dimension_numbers<[1], [1], [0], [0], [0, 0, 1, 0], [], []>} : vector<8x8xbf16>, vector<8x8xbf16>, vector<8x8xf32> -> vector<8x8xf32>
    %cst_36 = arith.constant dense<0xFF800000> : vector<8xf32>
    %94 = vector.multi_reduction <maximumf>, %93, %cst_36 [1] : vector<8x8xf32> to vector<8xf32>
    %95 = vector.shape_cast %94 : vector<8xf32> to vector<8x1xf32>
    %96 = vector.broadcast %95 : vector<8x1xf32> to vector<8x8xf32>
    %97 = arith.subf %93, %96 : vector<8x8xf32>
    %98 = math.exp %97 : vector<8x8xf32>
    %cst_37 = arith.constant dense<0.000000e+00> : vector<8xf32>
    %99 = vector.multi_reduction <add>, %98, %cst_37 [1] : vector<8x8xf32> to vector<8xf32>
    %100 = vector.shape_cast %99 : vector<8xf32> to vector<8x1xf32>
    %101 = tpu.reciprocal %100 {approx = true} : vector<8x1xf32> -> vector<8x1xf32>
    %102 = vector.broadcast %101 : vector<8x1xf32> to vector<8x8xf32>
    %103 = arith.mulf %98, %102 : vector<8x8xf32>
    %104 = arith.truncf %103 : vector<8x8xf32> to vector<8x8xbf16>
    %105 = vector.extract_strided_slice %51 {offsets = [0, 16], sizes = [8, 8], strides = [1, 1]} : vector<8x32xbf16> to vector<8x8xbf16>
    %cst_38 = arith.constant dense<0.000000e+00> : vector<8x8xf32>
    %106 = tpu.matmul %104, %105, %cst_38 {dimension_numbers = #tpu.dot_dimension_numbers<[1], [0], [0], [1], [0, 0, 1, 1], [], []>} : vector<8x8xbf16>, vector<8x8xbf16>, vector<8x8xf32> -> vector<8x8xf32>
    %107 = arith.truncf %106 : vector<8x8xf32> to vector<8x8xbf16>
    %108 = vector.extract_strided_slice %48 {offsets = [16, 0], sizes = [8, 32], strides = [1, 1]} : vector<32x32xbf16> to vector<8x32xbf16>
    %cst_39 = arith.constant dense<0.000000e+00> : vector<8x32xf32>
    %109 = tpu.matmul %107, %108, %cst_39 {dimension_numbers = #tpu.dot_dimension_numbers<[1], [0], [0], [1], [0, 0, 1, 1], [], []>} : vector<8x8xbf16>, vector<8x32xbf16>, vector<8x32xf32> -> vector<8x32xf32>
    %110 = arith.addf %90, %109 : vector<8x32xf32>
    %111 = vector.extract_strided_slice %49 {offsets = [0, 24], sizes = [8, 8], strides = [1, 1]} : vector<8x32xbf16> to vector<8x8xbf16>
    %112 = vector.extract_strided_slice %50 {offsets = [0, 24], sizes = [8, 8], strides = [1, 1]} : vector<8x32xbf16> to vector<8x8xbf16>
    %cst_40 = arith.constant dense<0.000000e+00> : vector<8x8xf32>
    %113 = tpu.matmul %111, %112, %cst_40 {dimension_numbers = #tpu.dot_dimension_numbers<[1], [1], [0], [0], [0, 0, 1, 0], [], []>} : vector<8x8xbf16>, vector<8x8xbf16>, vector<8x8xf32> -> vector<8x8xf32>
    %cst_41 = arith.constant dense<0xFF800000> : vector<8xf32>
    %114 = vector.multi_reduction <maximumf>, %113, %cst_41 [1] : vector<8x8xf32> to vector<8xf32>
    %115 = vector.shape_cast %114 : vector<8xf32> to vector<8x1xf32>
    %116 = vector.broadcast %115 : vector<8x1xf32> to vector<8x8xf32>
    %117 = arith.subf %113, %116 : vector<8x8xf32>
    %118 = math.exp %117 : vector<8x8xf32>
    %cst_42 = arith.constant dense<0.000000e+00> : vector<8xf32>
    %119 = vector.multi_reduction <add>, %118, %cst_42 [1] : vector<8x8xf32> to vector<8xf32>
    %120 = vector.shape_cast %119 : vector<8xf32> to vector<8x1xf32>
    %121 = tpu.reciprocal %120 {approx = true} : vector<8x1xf32> -> vector<8x1xf32>
    %122 = vector.broadcast %121 : vector<8x1xf32> to vector<8x8xf32>
    %123 = arith.mulf %118, %122 : vector<8x8xf32>
    %124 = arith.truncf %123 : vector<8x8xf32> to vector<8x8xbf16>
    %125 = vector.extract_strided_slice %51 {offsets = [0, 24], sizes = [8, 8], strides = [1, 1]} : vector<8x32xbf16> to vector<8x8xbf16>
    %cst_43 = arith.constant dense<0.000000e+00> : vector<8x8xf32>
    %126 = tpu.matmul %124, %125, %cst_43 {dimension_numbers = #tpu.dot_dimension_numbers<[1], [0], [0], [1], [0, 0, 1, 1], [], []>} : vector<8x8xbf16>, vector<8x8xbf16>, vector<8x8xf32> -> vector<8x8xf32>
    %127 = arith.truncf %126 : vector<8x8xf32> to vector<8x8xbf16>
    %128 = vector.extract_strided_slice %48 {offsets = [24, 0], sizes = [8, 32], strides = [1, 1]} : vector<32x32xbf16> to vector<8x32xbf16>
    %cst_44 = arith.constant dense<0.000000e+00> : vector<8x32xf32>
    %129 = tpu.matmul %127, %128, %cst_44 {dimension_numbers = #tpu.dot_dimension_numbers<[1], [0], [0], [1], [0, 0, 1, 1], [], []>} : vector<8x8xbf16>, vector<8x32xbf16>, vector<8x32xf32> -> vector<8x32xf32>
    %130 = arith.addf %110, %129 : vector<8x32xf32>
    %c2 = arith.constant 2 : index
    %c0_45 = arith.constant 0 : index
    %131 = vector.load %arg6[%c2, %c0_45] : memref<16x64xf32, #tpu.memory_space<vmem>>, vector<1x32xf32>
    %132 = vector.broadcast %131 : vector<1x32xf32> to vector<8x32xf32>
    %133 = arith.addf %130, %132 : vector<8x32xf32>
    %134 = arith.addf %1, %133 : vector<8x32xf32>
    %c11 = arith.constant 11 : index
    %c0_46 = arith.constant 0 : index
    %135 = vector.load %arg6[%c11, %c0_46] : memref<16x64xf32, #tpu.memory_space<vmem>>, vector<1x32xf32>
    %c12 = arith.constant 12 : index
    %c0_47 = arith.constant 0 : index
    %136 = vector.load %arg6[%c12, %c0_47] : memref<16x64xf32, #tpu.memory_space<vmem>>, vector<1x32xf32>
    %cst_48 = arith.constant dense<0.000000e+00> : vector<8xf32>
    %137 = vector.multi_reduction <add>, %134, %cst_48 [1] : vector<8x32xf32> to vector<8xf32>
    %138 = vector.shape_cast %137 : vector<8xf32> to vector<8x1xf32>
    %139 = arith.mulf %134, %134 : vector<8x32xf32>
    %cst_49 = arith.constant dense<0.000000e+00> : vector<8xf32>
    %140 = vector.multi_reduction <add>, %139, %cst_49 [1] : vector<8x32xf32> to vector<8xf32>
    %141 = vector.shape_cast %140 : vector<8xf32> to vector<8x1xf32>
    %cst_50 = arith.constant 3.125000e-02 : f32
    %142 = vector.broadcast %cst_50 : f32 to vector<8x1xf32>
    %143 = arith.mulf %138, %142 : vector<8x1xf32>
    %cst_51 = arith.constant 3.125000e-02 : f32
    %144 = vector.broadcast %cst_51 : f32 to vector<8x1xf32>
    %145 = arith.mulf %141, %144 : vector<8x1xf32>
    %146 = arith.mulf %143, %143 : vector<8x1xf32>
    %147 = arith.subf %145, %146 : vector<8x1xf32>
    %148 = vector.broadcast %143 : vector<8x1xf32> to vector<8x32xf32>
    %149 = arith.subf %134, %148 : vector<8x32xf32>
    %cst_52 = arith.constant 9.99999974E-6 : f32
    %150 = vector.broadcast %cst_52 : f32 to vector<8x1xf32>
    %151 = arith.addf %147, %150 : vector<8x1xf32>
    %152 = math.rsqrt %151 : vector<8x1xf32>
    %153 = vector.broadcast %152 : vector<8x1xf32> to vector<8x32xf32>
    %154 = arith.mulf %149, %153 : vector<8x32xf32>
    %155 = vector.broadcast %135 : vector<1x32xf32> to vector<8x32xf32>
    %156 = arith.mulf %154, %155 : vector<8x32xf32>
    %157 = vector.broadcast %136 : vector<1x32xf32> to vector<8x32xf32>
    %158 = arith.addf %156, %157 : vector<8x32xf32>
    %c64 = arith.constant 64 : index
    %c0_53 = arith.constant 0 : index
    %159 = vector.load %arg5[%c64, %c0_53] : memref<224x64xbf16, #tpu.memory_space<vmem>>, vector<32x64xbf16>
    %c96 = arith.constant 96 : index
    %c0_54 = arith.constant 0 : index
    %160 = vector.load %arg5[%c96, %c0_54] : memref<224x64xbf16, #tpu.memory_space<vmem>>, vector<32x64xbf16>
    %161 = arith.addf %158, %5 : vector<8x32xf32>
    %162 = arith.truncf %161 : vector<8x32xf32> to vector<8x32xbf16>
    %163 = vector.extract_strided_slice %159 {offsets = [0, 0], sizes = [32, 32], strides = [1, 1]} : vector<32x64xbf16> to vector<32x32xbf16>
    %cst_55 = arith.constant dense<0.000000e+00> : vector<8x32xf32>
    %164 = tpu.matmul %162, %163, %cst_55 {dimension_numbers = #tpu.dot_dimension_numbers<[1], [0], [0], [1], [0, 0, 1, 1], [], []>} : vector<8x32xbf16>, vector<32x32xbf16>, vector<8x32xf32> -> vector<8x32xf32>
    %c3 = arith.constant 3 : index
    %c0_56 = arith.constant 0 : index
    %165 = vector.load %arg6[%c3, %c0_56] : memref<16x64xf32, #tpu.memory_space<vmem>>, vector<1x32xf32>
    %166 = vector.broadcast %165 : vector<1x32xf32> to vector<8x32xf32>
    %167 = arith.addf %164, %166 : vector<8x32xf32>
    %168 = arith.addf %3, %7 : vector<16x32xf32>
    %169 = arith.truncf %168 : vector<16x32xf32> to vector<16x32xbf16>
    %170 = vector.extract_strided_slice %159 {offsets = [0, 32], sizes = [32, 32], strides = [1, 1]} : vector<32x64xbf16> to vector<32x32xbf16>
    %cst_57 = arith.constant dense<0.000000e+00> : vector<16x32xf32>
    %171 = tpu.matmul %169, %170, %cst_57 {dimension_numbers = #tpu.dot_dimension_numbers<[1], [0], [0], [1], [0, 0, 1, 1], [], []>} : vector<16x32xbf16>, vector<32x32xbf16>, vector<16x32xf32> -> vector<16x32xf32>
    %c4 = arith.constant 4 : index
    %c0_58 = arith.constant 0 : index
    %172 = vector.load %arg6[%c4, %c0_58] : memref<16x64xf32, #tpu.memory_space<vmem>>, vector<1x32xf32>
    %173 = vector.broadcast %172 : vector<1x32xf32> to vector<16x32xf32>
    %174 = arith.addf %171, %173 : vector<16x32xf32>
    %175 = arith.truncf %3 : vector<16x32xf32> to vector<16x32xbf16>
    %176 = vector.extract_strided_slice %160 {offsets = [0, 0], sizes = [32, 32], strides = [1, 1]} : vector<32x64xbf16> to vector<32x32xbf16>
    %cst_59 = arith.constant dense<0.000000e+00> : vector<16x32xf32>
    %177 = tpu.matmul %175, %176, %cst_59 {dimension_numbers = #tpu.dot_dimension_numbers<[1], [0], [0], [1], [0, 0, 1, 1], [], []>} : vector<16x32xbf16>, vector<32x32xbf16>, vector<16x32xf32> -> vector<16x32xf32>
    %c5 = arith.constant 5 : index
    %c0_60 = arith.constant 0 : index
    %178 = vector.load %arg6[%c5, %c0_60] : memref<16x64xf32, #tpu.memory_space<vmem>>, vector<1x32xf32>
    %179 = vector.broadcast %178 : vector<1x32xf32> to vector<16x32xf32>
    %180 = arith.addf %177, %179 : vector<16x32xf32>
    %181 = vector.extract_strided_slice %160 {offsets = [0, 32], sizes = [32, 32], strides = [1, 1]} : vector<32x64xbf16> to vector<32x32xbf16>
    %182 = arith.truncf %167 : vector<8x32xf32> to vector<8x32xbf16>
    %183 = arith.truncf %174 : vector<16x32xf32> to vector<16x32xbf16>
    %184 = arith.truncf %180 : vector<16x32xf32> to vector<16x32xbf16>
    %185 = vector.extract_strided_slice %182 {offsets = [0, 0], sizes = [8, 8], strides = [1, 1]} : vector<8x32xbf16> to vector<8x8xbf16>
    %186 = vector.extract_strided_slice %183 {offsets = [0, 0], sizes = [16, 8], strides = [1, 1]} : vector<16x32xbf16> to vector<16x8xbf16>
    %cst_61 = arith.constant dense<0.000000e+00> : vector<8x16xf32>
    %187 = tpu.matmul %185, %186, %cst_61 {dimension_numbers = #tpu.dot_dimension_numbers<[1], [1], [0], [0], [0, 0, 1, 0], [], []>} : vector<8x8xbf16>, vector<16x8xbf16>, vector<8x16xf32> -> vector<8x16xf32>
    %cst_62 = arith.constant dense<0xFF800000> : vector<8xf32>
    %188 = vector.multi_reduction <maximumf>, %187, %cst_62 [1] : vector<8x16xf32> to vector<8xf32>
    %189 = vector.shape_cast %188 : vector<8xf32> to vector<8x1xf32>
    %190 = vector.broadcast %189 : vector<8x1xf32> to vector<8x16xf32>
    %191 = arith.subf %187, %190 : vector<8x16xf32>
    %192 = math.exp %191 : vector<8x16xf32>
    %cst_63 = arith.constant dense<0.000000e+00> : vector<8xf32>
    %193 = vector.multi_reduction <add>, %192, %cst_63 [1] : vector<8x16xf32> to vector<8xf32>
    %194 = vector.shape_cast %193 : vector<8xf32> to vector<8x1xf32>
    %195 = tpu.reciprocal %194 {approx = true} : vector<8x1xf32> -> vector<8x1xf32>
    %196 = vector.broadcast %195 : vector<8x1xf32> to vector<8x16xf32>
    %197 = arith.mulf %192, %196 : vector<8x16xf32>
    %198 = arith.truncf %197 : vector<8x16xf32> to vector<8x16xbf16>
    %199 = vector.extract_strided_slice %184 {offsets = [0, 0], sizes = [16, 8], strides = [1, 1]} : vector<16x32xbf16> to vector<16x8xbf16>
    %cst_64 = arith.constant dense<0.000000e+00> : vector<8x8xf32>
    %200 = tpu.matmul %198, %199, %cst_64 {dimension_numbers = #tpu.dot_dimension_numbers<[1], [0], [0], [1], [0, 0, 1, 1], [], []>} : vector<8x16xbf16>, vector<16x8xbf16>, vector<8x8xf32> -> vector<8x8xf32>
    %201 = arith.truncf %200 : vector<8x8xf32> to vector<8x8xbf16>
    %202 = vector.extract_strided_slice %181 {offsets = [0, 0], sizes = [8, 32], strides = [1, 1]} : vector<32x32xbf16> to vector<8x32xbf16>
    %cst_65 = arith.constant dense<0.000000e+00> : vector<8x32xf32>
    %203 = tpu.matmul %201, %202, %cst_65 {dimension_numbers = #tpu.dot_dimension_numbers<[1], [0], [0], [1], [0, 0, 1, 1], [], []>} : vector<8x8xbf16>, vector<8x32xbf16>, vector<8x32xf32> -> vector<8x32xf32>
    %204 = vector.extract_strided_slice %182 {offsets = [0, 8], sizes = [8, 8], strides = [1, 1]} : vector<8x32xbf16> to vector<8x8xbf16>
    %205 = vector.extract_strided_slice %183 {offsets = [0, 8], sizes = [16, 8], strides = [1, 1]} : vector<16x32xbf16> to vector<16x8xbf16>
    %cst_66 = arith.constant dense<0.000000e+00> : vector<8x16xf32>
    %206 = tpu.matmul %204, %205, %cst_66 {dimension_numbers = #tpu.dot_dimension_numbers<[1], [1], [0], [0], [0, 0, 1, 0], [], []>} : vector<8x8xbf16>, vector<16x8xbf16>, vector<8x16xf32> -> vector<8x16xf32>
    %cst_67 = arith.constant dense<0xFF800000> : vector<8xf32>
    %207 = vector.multi_reduction <maximumf>, %206, %cst_67 [1] : vector<8x16xf32> to vector<8xf32>
    %208 = vector.shape_cast %207 : vector<8xf32> to vector<8x1xf32>
    %209 = vector.broadcast %208 : vector<8x1xf32> to vector<8x16xf32>
    %210 = arith.subf %206, %209 : vector<8x16xf32>
    %211 = math.exp %210 : vector<8x16xf32>
    %cst_68 = arith.constant dense<0.000000e+00> : vector<8xf32>
    %212 = vector.multi_reduction <add>, %211, %cst_68 [1] : vector<8x16xf32> to vector<8xf32>
    %213 = vector.shape_cast %212 : vector<8xf32> to vector<8x1xf32>
    %214 = tpu.reciprocal %213 {approx = true} : vector<8x1xf32> -> vector<8x1xf32>
    %215 = vector.broadcast %214 : vector<8x1xf32> to vector<8x16xf32>
    %216 = arith.mulf %211, %215 : vector<8x16xf32>
    %217 = arith.truncf %216 : vector<8x16xf32> to vector<8x16xbf16>
    %218 = vector.extract_strided_slice %184 {offsets = [0, 8], sizes = [16, 8], strides = [1, 1]} : vector<16x32xbf16> to vector<16x8xbf16>
    %cst_69 = arith.constant dense<0.000000e+00> : vector<8x8xf32>
    %219 = tpu.matmul %217, %218, %cst_69 {dimension_numbers = #tpu.dot_dimension_numbers<[1], [0], [0], [1], [0, 0, 1, 1], [], []>} : vector<8x16xbf16>, vector<16x8xbf16>, vector<8x8xf32> -> vector<8x8xf32>
    %220 = arith.truncf %219 : vector<8x8xf32> to vector<8x8xbf16>
    %221 = vector.extract_strided_slice %181 {offsets = [8, 0], sizes = [8, 32], strides = [1, 1]} : vector<32x32xbf16> to vector<8x32xbf16>
    %cst_70 = arith.constant dense<0.000000e+00> : vector<8x32xf32>
    %222 = tpu.matmul %220, %221, %cst_70 {dimension_numbers = #tpu.dot_dimension_numbers<[1], [0], [0], [1], [0, 0, 1, 1], [], []>} : vector<8x8xbf16>, vector<8x32xbf16>, vector<8x32xf32> -> vector<8x32xf32>
    %223 = arith.addf %203, %222 : vector<8x32xf32>
    %224 = vector.extract_strided_slice %182 {offsets = [0, 16], sizes = [8, 8], strides = [1, 1]} : vector<8x32xbf16> to vector<8x8xbf16>
    %225 = vector.extract_strided_slice %183 {offsets = [0, 16], sizes = [16, 8], strides = [1, 1]} : vector<16x32xbf16> to vector<16x8xbf16>
    %cst_71 = arith.constant dense<0.000000e+00> : vector<8x16xf32>
    %226 = tpu.matmul %224, %225, %cst_71 {dimension_numbers = #tpu.dot_dimension_numbers<[1], [1], [0], [0], [0, 0, 1, 0], [], []>} : vector<8x8xbf16>, vector<16x8xbf16>, vector<8x16xf32> -> vector<8x16xf32>
    %cst_72 = arith.constant dense<0xFF800000> : vector<8xf32>
    %227 = vector.multi_reduction <maximumf>, %226, %cst_72 [1] : vector<8x16xf32> to vector<8xf32>
    %228 = vector.shape_cast %227 : vector<8xf32> to vector<8x1xf32>
    %229 = vector.broadcast %228 : vector<8x1xf32> to vector<8x16xf32>
    %230 = arith.subf %226, %229 : vector<8x16xf32>
    %231 = math.exp %230 : vector<8x16xf32>
    %cst_73 = arith.constant dense<0.000000e+00> : vector<8xf32>
    %232 = vector.multi_reduction <add>, %231, %cst_73 [1] : vector<8x16xf32> to vector<8xf32>
    %233 = vector.shape_cast %232 : vector<8xf32> to vector<8x1xf32>
    %234 = tpu.reciprocal %233 {approx = true} : vector<8x1xf32> -> vector<8x1xf32>
    %235 = vector.broadcast %234 : vector<8x1xf32> to vector<8x16xf32>
    %236 = arith.mulf %231, %235 : vector<8x16xf32>
    %237 = arith.truncf %236 : vector<8x16xf32> to vector<8x16xbf16>
    %238 = vector.extract_strided_slice %184 {offsets = [0, 16], sizes = [16, 8], strides = [1, 1]} : vector<16x32xbf16> to vector<16x8xbf16>
    %cst_74 = arith.constant dense<0.000000e+00> : vector<8x8xf32>
    %239 = tpu.matmul %237, %238, %cst_74 {dimension_numbers = #tpu.dot_dimension_numbers<[1], [0], [0], [1], [0, 0, 1, 1], [], []>} : vector<8x16xbf16>, vector<16x8xbf16>, vector<8x8xf32> -> vector<8x8xf32>
    %240 = arith.truncf %239 : vector<8x8xf32> to vector<8x8xbf16>
    %241 = vector.extract_strided_slice %181 {offsets = [16, 0], sizes = [8, 32], strides = [1, 1]} : vector<32x32xbf16> to vector<8x32xbf16>
    %cst_75 = arith.constant dense<0.000000e+00> : vector<8x32xf32>
    %242 = tpu.matmul %240, %241, %cst_75 {dimension_numbers = #tpu.dot_dimension_numbers<[1], [0], [0], [1], [0, 0, 1, 1], [], []>} : vector<8x8xbf16>, vector<8x32xbf16>, vector<8x32xf32> -> vector<8x32xf32>
    %243 = arith.addf %223, %242 : vector<8x32xf32>
    %244 = vector.extract_strided_slice %182 {offsets = [0, 24], sizes = [8, 8], strides = [1, 1]} : vector<8x32xbf16> to vector<8x8xbf16>
    %245 = vector.extract_strided_slice %183 {offsets = [0, 24], sizes = [16, 8], strides = [1, 1]} : vector<16x32xbf16> to vector<16x8xbf16>
    %cst_76 = arith.constant dense<0.000000e+00> : vector<8x16xf32>
    %246 = tpu.matmul %244, %245, %cst_76 {dimension_numbers = #tpu.dot_dimension_numbers<[1], [1], [0], [0], [0, 0, 1, 0], [], []>} : vector<8x8xbf16>, vector<16x8xbf16>, vector<8x16xf32> -> vector<8x16xf32>
    %cst_77 = arith.constant dense<0xFF800000> : vector<8xf32>
    %247 = vector.multi_reduction <maximumf>, %246, %cst_77 [1] : vector<8x16xf32> to vector<8xf32>
    %248 = vector.shape_cast %247 : vector<8xf32> to vector<8x1xf32>
    %249 = vector.broadcast %248 : vector<8x1xf32> to vector<8x16xf32>
    %250 = arith.subf %246, %249 : vector<8x16xf32>
    %251 = math.exp %250 : vector<8x16xf32>
    %cst_78 = arith.constant dense<0.000000e+00> : vector<8xf32>
    %252 = vector.multi_reduction <add>, %251, %cst_78 [1] : vector<8x16xf32> to vector<8xf32>
    %253 = vector.shape_cast %252 : vector<8xf32> to vector<8x1xf32>
    %254 = tpu.reciprocal %253 {approx = true} : vector<8x1xf32> -> vector<8x1xf32>
    %255 = vector.broadcast %254 : vector<8x1xf32> to vector<8x16xf32>
    %256 = arith.mulf %251, %255 : vector<8x16xf32>
    %257 = arith.truncf %256 : vector<8x16xf32> to vector<8x16xbf16>
    %258 = vector.extract_strided_slice %184 {offsets = [0, 24], sizes = [16, 8], strides = [1, 1]} : vector<16x32xbf16> to vector<16x8xbf16>
    %cst_79 = arith.constant dense<0.000000e+00> : vector<8x8xf32>
    %259 = tpu.matmul %257, %258, %cst_79 {dimension_numbers = #tpu.dot_dimension_numbers<[1], [0], [0], [1], [0, 0, 1, 1], [], []>} : vector<8x16xbf16>, vector<16x8xbf16>, vector<8x8xf32> -> vector<8x8xf32>
    %260 = arith.truncf %259 : vector<8x8xf32> to vector<8x8xbf16>
    %261 = vector.extract_strided_slice %181 {offsets = [24, 0], sizes = [8, 32], strides = [1, 1]} : vector<32x32xbf16> to vector<8x32xbf16>
    %cst_80 = arith.constant dense<0.000000e+00> : vector<8x32xf32>
    %262 = tpu.matmul %260, %261, %cst_80 {dimension_numbers = #tpu.dot_dimension_numbers<[1], [0], [0], [1], [0, 0, 1, 1], [], []>} : vector<8x8xbf16>, vector<8x32xbf16>, vector<8x32xf32> -> vector<8x32xf32>
    %263 = arith.addf %243, %262 : vector<8x32xf32>
    %c6 = arith.constant 6 : index
    %c0_81 = arith.constant 0 : index
    %264 = vector.load %arg6[%c6, %c0_81] : memref<16x64xf32, #tpu.memory_space<vmem>>, vector<1x32xf32>
    %265 = vector.broadcast %264 : vector<1x32xf32> to vector<8x32xf32>
    %266 = arith.addf %263, %265 : vector<8x32xf32>
    %267 = arith.addf %134, %266 : vector<8x32xf32>
    %c13 = arith.constant 13 : index
    %c0_82 = arith.constant 0 : index
    %268 = vector.load %arg6[%c13, %c0_82] : memref<16x64xf32, #tpu.memory_space<vmem>>, vector<1x32xf32>
    %c14 = arith.constant 14 : index
    %c0_83 = arith.constant 0 : index
    %269 = vector.load %arg6[%c14, %c0_83] : memref<16x64xf32, #tpu.memory_space<vmem>>, vector<1x32xf32>
    %cst_84 = arith.constant dense<0.000000e+00> : vector<8xf32>
    %270 = vector.multi_reduction <add>, %267, %cst_84 [1] : vector<8x32xf32> to vector<8xf32>
    %271 = vector.shape_cast %270 : vector<8xf32> to vector<8x1xf32>
    %272 = arith.mulf %267, %267 : vector<8x32xf32>
    %cst_85 = arith.constant dense<0.000000e+00> : vector<8xf32>
    %273 = vector.multi_reduction <add>, %272, %cst_85 [1] : vector<8x32xf32> to vector<8xf32>
    %274 = vector.shape_cast %273 : vector<8xf32> to vector<8x1xf32>
    %cst_86 = arith.constant 3.125000e-02 : f32
    %275 = vector.broadcast %cst_86 : f32 to vector<8x1xf32>
    %276 = arith.mulf %271, %275 : vector<8x1xf32>
    %cst_87 = arith.constant 3.125000e-02 : f32
    %277 = vector.broadcast %cst_87 : f32 to vector<8x1xf32>
    %278 = arith.mulf %274, %277 : vector<8x1xf32>
    %279 = arith.mulf %276, %276 : vector<8x1xf32>
    %280 = arith.subf %278, %279 : vector<8x1xf32>
    %281 = vector.broadcast %276 : vector<8x1xf32> to vector<8x32xf32>
    %282 = arith.subf %267, %281 : vector<8x32xf32>
    %cst_88 = arith.constant 9.99999974E-6 : f32
    %283 = vector.broadcast %cst_88 : f32 to vector<8x1xf32>
    %284 = arith.addf %280, %283 : vector<8x1xf32>
    %285 = math.rsqrt %284 : vector<8x1xf32>
    %286 = vector.broadcast %285 : vector<8x1xf32> to vector<8x32xf32>
    %287 = arith.mulf %282, %286 : vector<8x32xf32>
    %288 = vector.broadcast %268 : vector<1x32xf32> to vector<8x32xf32>
    %289 = arith.mulf %287, %288 : vector<8x32xf32>
    %290 = vector.broadcast %269 : vector<1x32xf32> to vector<8x32xf32>
    %291 = arith.addf %289, %290 : vector<8x32xf32>
    %292 = arith.truncf %291 : vector<8x32xf32> to vector<8x32xbf16>
    %c128 = arith.constant 128 : index
    %c0_89 = arith.constant 0 : index
    %293 = vector.load %arg5[%c128, %c0_89] : memref<224x64xbf16, #tpu.memory_space<vmem>>, vector<32x64xbf16>
    %cst_90 = arith.constant dense<0.000000e+00> : vector<8x64xf32>
    %294 = tpu.matmul %292, %293, %cst_90 {dimension_numbers = #tpu.dot_dimension_numbers<[1], [0], [0], [1], [0, 0, 1, 1], [], []>} : vector<8x32xbf16>, vector<32x64xbf16>, vector<8x64xf32> -> vector<8x64xf32>
    %c7 = arith.constant 7 : index
    %c0_91 = arith.constant 0 : index
    %295 = vector.load %arg6[%c7, %c0_91] : memref<16x64xf32, #tpu.memory_space<vmem>>, vector<1x64xf32>
    %296 = vector.broadcast %295 : vector<1x64xf32> to vector<8x64xf32>
    %297 = arith.addf %294, %296 : vector<8x64xf32>
    %cst_92 = arith.constant 0.000000e+00 : f32
    %298 = vector.broadcast %cst_92 : f32 to vector<8x64xf32>
    %299 = arith.cmpf oge, %297, %298 : vector<8x64xf32>
    %cst_93 = arith.constant 0.00999999977 : f32
    %300 = vector.broadcast %cst_93 : f32 to vector<8x64xf32>
    %301 = arith.mulf %300, %297 : vector<8x64xf32>
    %302 = arith.select %299, %297, %301 : vector<8x64xi1>, vector<8x64xf32>
    %303 = arith.truncf %302 : vector<8x64xf32> to vector<8x64xbf16>
    %c160 = arith.constant 160 : index
    %c0_94 = arith.constant 0 : index
    %304 = vector.load %arg5[%c160, %c0_94] : memref<224x64xbf16, #tpu.memory_space<vmem>>, vector<64x32xbf16>
    %cst_95 = arith.constant dense<0.000000e+00> : vector<8x32xf32>
    %305 = tpu.matmul %303, %304, %cst_95 {dimension_numbers = #tpu.dot_dimension_numbers<[1], [0], [0], [1], [0, 0, 1, 1], [], []>} : vector<8x64xbf16>, vector<64x32xbf16>, vector<8x32xf32> -> vector<8x32xf32>
    %c8 = arith.constant 8 : index
    %c0_96 = arith.constant 0 : index
    %306 = vector.load %arg6[%c8, %c0_96] : memref<16x64xf32, #tpu.memory_space<vmem>>, vector<1x32xf32>
    %307 = vector.broadcast %306 : vector<1x32xf32> to vector<8x32xf32>
    %308 = arith.addf %305, %307 : vector<8x32xf32>
    %309 = arith.addf %267, %308 : vector<8x32xf32>
    %c0_97 = arith.constant 0 : index
    %c0_98 = arith.constant 0 : index
    %c0_99 = arith.constant 0 : index
    %310 = vector.load %arg7[%c0_97, %c0_98, %c0_99] : memref<1x8x32xf32, #tpu.memory_space<vmem>>, vector<1x8x32xf32>
    %311 = vector.shape_cast %310 : vector<1x8x32xf32> to vector<8x32xf32>
    %312 = vector.shape_cast %309 : vector<8x32xf32> to vector<1x8x32xf32>
    tpu.vector_store %arg7[%c0_97, %c0_98, %c0_99], %312 {strides = array<i32>} : memref<1x8x32xf32, #tpu.memory_space<vmem>>, vector<1x8x32xf32>,
    return
  }
  func.func @transform_0(%arg0: i32) -> (i32, i32, i32) {
    %c0_i32 = arith.constant 0 : i32
    %c0_i32_0 = arith.constant 0 : i32
    %c0_i32_1 = arith.constant 0 : i32
    return %arg0, %c0_i32, %c0_i32_0 : i32, i32, i32
  }
  func.func @transform_1(%arg0: i32) -> (i32, i32, i32) {
    %c0_i32 = arith.constant 0 : i32
    %c0_i32_0 = arith.constant 0 : i32
    %c0_i32_1 = arith.constant 0 : i32
    return %arg0, %c0_i32, %c0_i32_0 : i32, i32, i32
  }
  func.func @transform_2(%arg0: i32) -> (i32, i32, i32) {
    %c0_i32 = arith.constant 0 : i32
    %c0_i32_0 = arith.constant 0 : i32
    %c0_i32_1 = arith.constant 0 : i32
    return %arg0, %c0_i32, %c0_i32_0 : i32, i32, i32
  }
  func.func @transform_3(%arg0: i32) -> (i32, i32, i32) {
    %c0_i32 = arith.constant 0 : i32
    %c0_i32_0 = arith.constant 0 : i32
    %c0_i32_1 = arith.constant 0 : i32
    return %arg0, %c0_i32, %c0_i32_0 : i32, i32, i32
  }
  func.func @transform_4(%arg0: i32) -> (i32, i32) {
    %c0_i32 = arith.constant 0 : i32
    %c0_i32_0 = arith.constant 0 : i32
    %c0_i32_1 = arith.constant 0 : i32
    return %c0_i32, %c0_i32_0 : i32, i32
  }
  func.func @transform_5(%arg0: i32) -> (i32, i32) {
    %c0_i32 = arith.constant 0 : i32
    %c0_i32_0 = arith.constant 0 : i32
    %c0_i32_1 = arith.constant 0 : i32
    return %c0_i32, %c0_i32_0 : i32, i32
  }
  func.func @transform_6(%arg0: i32) -> (i32, i32, i32) {
    %c0_i32 = arith.constant 0 : i32
    %c0_i32_0 = arith.constant 0 : i32
    %c0_i32_1 = arith.constant 0 : i32
    return %arg0, %c0_i32, %c0_i32_0 : i32, i32, i32
  }
}

</mosaic_0001>

<bundles_post_ra>
// kernel: tpu_custom_call.1
= control target key start
LH: loop header
LB: loop body
LE: loop exit
PB: predicated region body
PF: predicated region fallthrough
CT: control target
= control target key end

     0   :  { %11 = vsyncpa [#allocation3], 0  ;;  %s2111_s0 = inlined_call_operand.vmem [shape: f32[2,8,32], index: 0, kind: input, shape index: {}]   ;;  %s2112_s1 = inlined_call_operand.vmem [shape: f32[2,16,32], index: 1, kind: input, shape index: {}]   ;;  %s2113_s2 = inlined_call_operand.vmem [shape: f32[2,8,32], index: 2, kind: input, shape index: {}]   ;;  %s2114_s3 = inlined_call_operand.vmem [shape: f32[2,16,32], index: 3, kind: input, shape index: {}]   ;;  %s2115_s4 = inlined_call_operand.vmem [shape: bf16[224,64], index: 4, kind: input, shape index: {}]   ;;  %s2116_s5 = inlined_call_operand.vmem [shape: f32[16,64], index: 5, kind: input, shape index: {}]   ;;  %s2117_s6 = inlined_call_operand.hbm [shape: f32[2,8,32], index: 6, kind: output, shape index: {}]  }
   0x1   :  { %13 = vsyncpa [#allocation3 + $0x1], 0  ;;  %s1754_s21 = smov 0   ;;  %s1756_s22 = smov 0  }
   0x2   :  { %s1758_s23 = smov 0   ;;  %s1760_s24 = smov 0  }
   0x3 LB: > { %s1775_s25 = sadd.s32 4294967295, %s1710_s24   ;;  %s1431_s26 = sadd.s32 4294967294, %s1710_s24   ;;  %s1710_s24 = sphi %s1760_s24, %s2123_s24   ;;  %s1706_s23 = sphi %s1758_s23, %s2122_s23   ;;  %s1702_s22 = sphi %s1756_s22, %s2121_s22   ;;  %s1698_s21 = sphi %s1754_s21, %s2120_s21  }
   0x4   : > { %s1779_s27 = sadd.s32 1, %s1710_s24   ;;  %s172_s28 = sadd.s32 1, %s1706_s23 }
   0x5   : > { %s169_s29 = ssub.s32 %s1710_s24, %s1779_s27  ;;  %p182_p0 = scmp.ne.s32.totalorder %s1706_s23, %s1702_s22 }
   0x6   : > { %p170_p1 = scmp.eq.s32.totalorder %s169_s29, 0  ;;  %p183_p2 = scmp.eq.s32.totalorder %s1775_s25, 1 }
   0x7   : > { %p188_p3 = scmp.ne.s32.totalorder %s1702_s22, %s1698_s21  ;;  %p189_p4 = scmp.eq.s32.totalorder %s1431_s26, 1 }
   0x8   : > { %s1790_s30 = scalar_select %p170_p1, %s1706_s23, %s172_s28  }
   0x9   : > { %p1792_p5 = por %p183_p2, %p182_p0  ;;  %p1796_p6 = por %p189_p4, %p188_p3 }
   0xa   : > { %p1434_p7 = scmp.ge.s32.totalorder %s1710_s24, 1  ;;  %p243_p8 = scmp.lt.s32.totalorder %s1710_s24, 3 }
   0xc   : > { %p244_p9 = pnand %p1434_p7, %p243_p8 }
   0xd   : > { %p286_p10 = scmp.lt.s32.totalorder (!%p244_p9), %s1775_s25, 1  ;;  %s1712_s16 = smov (!%p244_p9), 96  }
   0xe   : > { %247 = sbr.rel (%p244_p9) target bundleno = 3539 (0xdd3), region = 44  ;;  %s1713_s20 = smov (!%p244_p9), 72  }
   0xf   : > { %s1714_s26 = smov (!%p244_p9), 104   ;;  %s1715_s28 = smov (!%p244_p9), 88  }
  0x10   : > { %s1716_s29 = smov (!%p244_p9), 120   ;;  %s1717_s11 = smov (!%p244_p9), 80  }
  0x11   : > { %s1718_s12 = smov (!%p244_p9), 112  }
  0x13   : > { %s1804_s9 = scalar_select %p286_p10, %s1775_s25, 1  ;;  %vm313_vm0 = vcmask 261120   ;;  %v1822_v5 = vld [vmem:[%s2115_s4 + $0x18] sm:$0xff]   ;;  %v1520_v6 = vld [vmem:[%s2115_s4 + $0x8] sm:$0xff]  ;;  %v1831_v7 = vld [vmem:[%s2115_s4 + $0x10] sm:$0xff]   ;;  %vm455_vm4 = vcmask 1043456  }
  0x14   : > { %406 = vmatpush.bf16.msra.mxu1 %v1822_v5  ;;  %371 = vmatpush.bf16.msra.mxu0 %v1520_v6  ;;  %v1519_v8 = vld [vmem:[%s2115_s4] sm:$0xff]  ;;  %v1595_v22 = vld [vmem:[%s2116_s5 + $0x9] ss:$0 sm:$0xff]  ;;  %v1596_v25 = vld [vmem:[%s2116_s5 + $0xa] ss:$0 sm:$0xff]  ;;  %v1531_v32 = vunpack.c.l.b16 %v1831_v7  ;;  %vm420_vm5 = vcmask 64512  }
  0x15   : > { %s1436_s10 = sshll.u32 %s1804_s9, 3  ;;  %v1597_v34 = vld [vmem:[%s2116_s5 + $0x1] ss:$0 sm:$0xff]  ;;  %v1598_v35 = vld [vmem:[%s2116_s5] ss:$0 sm:$0xff]  ;;  %s1517_s19 = sshll.u32 %s1804_s9, 4 }
  0x16   : > { %s289_s13 = scalar_lea.vmem %s2111_s0, %s1436_s10  ;;  %s298_s15 = scalar_lea.vmem %s2113_s2, %s1436_s10  ;;  %v555_v33 = vpack.c.b16 %v1531_v32, %v1531_v32  ;;  %vm900_vm9 = vcmask 130048   ;;  %vm1301_vm14 = vcmask 523264  }
  0x17   : > { %v1812_v0 = vld [vmem:[%s289_s13] sm:$0xff] }
  0x18   : > { %v314_v1 = vsel %vm313_vm0, %v1812_v0, 0.0  ;;  %v317_v2 = vmul.f32 %v1812_v0, %v1812_v0  ;;  %407 = vmatpush.bf16.msra.mxu1 %v1831_v7  ;;  %372 = vmatpush.bf16.msra.mxu0 %v1519_v8  ;;  %v1849_v27 = vld [vmem:[%s298_s15] sm:$0xff]  ;;  %s303_s15 = scalar_lea.vmem %s2114_s3, %s1517_s19 }
  0x19   : > { %315 = vadd.xlane.f32.xlu0 %v314_v1 }
  0x1a   : > { %v318_v3 = vsel %vm313_vm0, %v317_v2, 0.0 }
  0x21   : > { %319 = vadd.xlane.f32.xlu0 %v318_v3 }
  0x35   : > { %556 = vrot.lane.b32.xlu0 %v555_v33, %s1712_s16 }
  0x8c   : > { %v316_v4 = vpop.xlane.xlu0 %315 }
  0x8d   : > { %v321_v9 = vmul.f32 0.03125, %v316_v4 }
  0x8f   : > { %v323_v11 = vmul.f32 %v321_v9, %v321_v9  ;;  %v325_v21 = vsub.f32 %v1812_v0, %v321_v9 }
  0x94   : > { %v320_v10 = vpop.xlane.xlu0 %319 }
  0x95   : > { %v322_v12 = vmul.f32 0.03125, %v320_v10 }
  0x97   : > { %v324_v13 = vsub.f32 %v322_v12, %v323_v11 }
  0x99   : > { %v326_v14 = vadd.f32 1e-05, %v324_v13 }
  0x9b   : > { %1610 = vrsqrt.f32 %v326_v14  ;;  %vm333_vm2 = vweird.f32 %v326_v14 }
  0xa1   : > { %v1611_v15 = vpop.eup %1610 }
  0xa2   : > { %v328_v16 = vmul.f32 %v1611_v15, %v326_v14  ;;  %vm334_vm1 = vweird.f32 %v1611_v15 }
  0xa3   : > { %vm335_vm3 = vmor %vm333_vm2, %vm334_vm1 }
  0xa4   : > { %v329_v17 = vmul.f32 %v1611_v15, %v328_v16 }
  0xa6   : > { %v330_v18 = vmul.f32 0.5, %v329_v17 }
  0xa7   : > { %v557_v47 = vpop.permute.xlu0 %556 }
  0xa8   : > { %v331_v19 = vsub.f32 1.5, %v330_v18  ;;  %v562_v49 = vsel %vm455_vm4, %v557_v47, 0 }
  0xaa   : > { %v332_v20 = vmul.f32 %v1611_v15, %v331_v19 }
  0xac   : > { %v336_v23 = vsel %vm335_vm3, %v1611_v15, %v332_v20 }
  0xad   : > { %v337_v24 = vmul.f32 %v336_v23, %v325_v21 }
  0xaf   : > { %v339_v26 = vmul.f32 %v1595_v22, %v337_v24 }
  0xb1   : > { %v341_v28 = vadd.f32 %v1596_v25, %v339_v26 }
  0xb3   : > { %v382_v29 = vpack.c.bf16 %v341_v28, %v341_v28  ;;  %v342_v30 = vadd.f32 %v341_v28, %v1849_v27 }
  0xb5   : > { %1451 = vmatmul.msk.bf16.vlgmr.msra.gmra.mxu1 %vm313_vm0, %v382_v29  ;;  %v343_v31 = vpack.c.bf16 %v342_v30, %v342_v30 }
  0xb7   : > { %1450 = vmatmul.msk.bf16.vlgmr.msra.gmra.mxu0 %vm313_vm0, %v343_v31 }
 0x132   : > { %v409_v36 = vpop.f32.mrf.mxu1 }
 0x133   : > { %v410_v37 = vadd.f32 %v1597_v34, %v409_v36 }
 0x134   : > { %v374_v38 = vpop.f32.mrf.mxu0 }
 0x135   : > { %v1862_v39 = vpack.c.bf16 %v410_v37, %v410_v37  ;;  %v375_v40 = vadd.f32 %v1598_v35, %v374_v38 }
 0x137   : > { %v413_v41 = vpack.c.bf16 %v375_v40, %v375_v40  ;;  %v457_v42 = vsel %vm455_vm4, %v1862_v39, 0  ;;  %v509_v20 = vunpack.c.l.b16 %v1862_v39 }
 0x138   : > { %466 = vmatpush.bf16.msra.mxu3 %v457_v42  ;;  %v1535_v42 = vunpack.c.l.b16 %v1822_v5 }
 0x139   : > { %v416_v43 = vunpack.c.l.b16 %v413_v41  ;;  %v510_v21 = vpack.c.b16 %v509_v20, %v509_v20 }
 0x13a   : > { %v411_v44 = vpop.f32.mrf.mxu1 }
 0x13b   : > { %v417_v45 = vpack.c.b16 %v416_v43, %v416_v43  ;;  %v1532_v43 = vunpack.c.h.b16 %v1831_v7 }
 0x13c   : > { %v376_v46 = vpop.f32.mrf.mxu0 }
 0x13d   : > { %659 = vrot.lane.b32.xlu0 %v417_v45, %s1713_s20  ;;  %418 = vrot.lane.b32.xlu1 %v417_v45, %s1712_s16  ;;  %v634_v46 = vpack.c.b16 %v1535_v42, %v1535_v42  ;;  %v533_v47 = vpack.c.b16 %v1532_v43, %v1532_v43 }
 0x145   : > { %657 = vrot.lane.b32.xlu0 %v417_v45, %s1714_s26 }
 0x1af   : > { %v419_v48 = vpop.permute.xlu1 %418  ;;  %v660_v51 = vpop.permute.xlu0 %659 }
 0x1b0   : > { %v425_v50 = vsel %vm420_vm5, %v419_v48, 0  ;;  %v665_v52 = vsel %vm420_vm5, %v660_v51, 0 }
 0x1b1   : > { %434 = vmatpush.bf16.xpose.msra.mxu2 %v425_v50 }
 0x1b7   : > { %v658_v15 = vpop.permute.xlu0 %657 }
 0x1b8   : > { %1452 = vmatmul.msk.bf16.vlgmr.msra.gmra.mxu2 %vm420_vm5, %v413_v41 }
 0x1b9   : > { %571 = vmatpush.bf16.msrb.mxu2 %v562_v49 }
 0x1bd   : > { %674 = vmatpush.bf16.xpose.msra.mxu2 %v665_v52 }
 0x23b   : > { %v436_v53 = vpop.f32.mrf.mxu2 }
 0x23c   : > { %v440_v54 = vsel %vm420_vm5, %v436_v53, -inf }
 0x23d   : > { %441 = vmax.xlane.f32.xlu1 %v440_v54 }
 0x243   : > { %v438_v55 = vpop.f32.mrf.mxu2 }
 0x2b0   : > { %v442_v56 = vpop.xlane.xlu1 %441 }
 0x2b1   : > { %v443_v57 = vsub.f32 %v436_v53, %v442_v56 }
 0x2b3   : > { %v444_v58 = vmul.f32 1.442695, %v443_v57 }
 0x2b5   : > { %1612 = vpow2.f32 %v444_v58 }
 0x2bb   : > { %v1613_v59 = vpop.eup %1612 }
 0x2bc   : > { %v446_v60 = vsel %vm420_vm5, %v1613_v59, 0.0 }
 0x2bd   : > { %447 = vadd.xlane.f32.xlu2 %v446_v60 }
 0x2d5   : > { %475 = vrot.lane.b32.xlu2 %v417_v45, %s1715_s28  ;;  %s1514_s28 = sshll.u32 %s1775_s25, 3 }
 0x2d6   : > { %s1331_s9 = scalar_lea.hbm %s2117_s6, %s1514_s28 }
 0x2dd   : > { %473 = vrot.lane.b32.xlu2 %v417_v45, %s1716_s29 }
 0x2e5   : > { %579 = vrot.lane.b32.xlu2 %v417_v45, %s1717_s11  ;;  %s294_s11 = scalar_lea.vmem %s2112_s1, %s1517_s19  ;;  %s283_s19 = sand.u32 1, %s1702_s22  }
 0x2e6   : > { %s1435_s20 = sshll.u32 %s283_s19, 3  ;;  %s1321_s25 = scalar_lea.sflag [#allocation3], %s283_s19 }
 0x2e7   : > { %s285_s17 = scalar_lea.vmem [#allocation2], %s1435_s20  ;;  %s1668_s20 = scalar_lea.hbm %s2117_s6, 16 }
 0x2e8   : > { %s1333_s10 = sshll.u32 %s285_s17, 4  ;;  %s1334_s10 = int_to_ptr.vmem [resolvable:$true] %s1333_s10 }
 0x2ed   : > { %577 = vrot.lane.b32.xlu2 %v417_v45, %s1718_s12 }
 0x330   : > { %v448_v61 = vpop.xlane.xlu2 %447 }
 0x331   : > { %1614 = vrcp.f32 %v448_v61 }
 0x337   : > { %v1615_v62 = vpop.eup %1614 }
 0x338   : > { %v476_v63 = vpop.permute.xlu2 %475  ;;  %v450_v1 = vmul.f32 %v1615_v62, %v1613_v59 }
 0x339   : > { %v481_v2 = vsel %vm420_vm5, %v476_v63, 0 }
 0x33a   : > { %490 = vmatpush.bf16.xpose.msrb.mxu3 %v481_v2  ;;  %v451_v3 = vpack.c.bf16 %v450_v1, %v450_v1 }
 0x33c   : > { %1453 = vmatmul.msk.bf16.vlgmr.msra.gmra.mxu3 %vm420_vm5, %v451_v3  ;;  %v1536_v3 = vunpack.c.h.b16 %v1822_v5 }
 0x340   : > { %v474_v4 = vpop.permute.xlu2 %473 }
 0x348   : > { %v580_v6 = vpop.permute.xlu2 %579 }
 0x349   : > { %v585_v8 = vsel %vm420_vm5, %v580_v6, 0 }
 0x34a   : > { %594 = vmatpush.bf16.xpose.msra.mxu3 %v585_v8  ;;  %v714_v8 = vpack.c.b16 %v1536_v3, %v1536_v3 }
 0x34c   : > { %1454 = vmatmul.msk.bf16.vlgmr.msrb.gmra.mxu3 %vm420_vm5, %v474_v4 }
 0x350   : > { %v578_v9 = vpop.permute.xlu2 %577 }
 0x35c   : > { %1458 = vmatmul.msk.bf16.vlgmr.msra.gmra.mxu3 %vm420_vm5, %v578_v9 }
 0x3bf   : > { %v468_v10 = vpop.f32.mrf.mxu3 }
 0x3c0   : > { %v472_v11 = vpack.c.bf16 %v468_v10, %v468_v10 }
 0x3c2   : > { %1457 = vmatmul.msk.bf16.vlgmr.msrb.gmra.mxu2 %vm420_vm5, %v472_v11 }
 0x3c7   : > { %v470_v12 = vpop.f32.mrf.mxu3 }
 0x3cf   : > { %v492_v13 = vpop.f32.mrf.mxu3 }
 0x3d0   : > { %v496_v14 = vsel %vm420_vm5, %v492_v13, -inf }
 0x3d1   : > { %497 = vmax.xlane.f32.xlu1 %v496_v14 }
 0x3d2   : > { %1461 = vmatmul.msk.bf16.vlgmr.msra.gmra.mxu2 %vm420_vm5, %v658_v15 }
 0x3d7   : > { %v494_v16 = vpop.f32.mrf.mxu3 }
 0x3df   : > { %v596_v17 = vpop.f32.mrf.mxu3 }
 0x3e0   : > { %v600_v18 = vsel %vm420_vm5, %v596_v17, -inf }
 0x3e1   : > { %601 = vmax.xlane.f32.xlu2 %v600_v18 }
 0x3e7   : > { %v598_v19 = vpop.f32.mrf.mxu3 }
 0x3f9   : > { %692 = vrot.lane.b32.xlu2 %v510_v21, %s1714_s26 }
 0x401   : > { %534 = vrot.lane.b32.xlu2 %v533_v47, %s1712_s16 }
 0x409   : > { %715 = vrot.lane.b32.xlu2 %v714_v8, %s1712_s16 }
 0x444   : > { %v498_v22 = vpop.xlane.xlu1 %497 }
 0x445   : > { %v499_v23 = vsub.f32 %v492_v13, %v498_v22  ;;  %v1887_v24 = vpop.f32.mrf.mxu2 }
 0x447   : > { %v500_v25 = vmul.f32 1.442695, %v499_v23 }
 0x449   : > { %1616 = vpow2.f32 %v500_v25 }
 0x44d   : > { %v575_v26 = vpop.f32.mrf.mxu2 }
 0x44e   : > { %v1599_v26 = vld [vmem:[%s2116_s5 + $0x2] ss:$0 sm:$0xff] }
 0x44f   : > { %v1617_v28 = vpop.eup %1616 }
 0x450   : > { %v502_v29 = vsel %vm420_vm5, %v1617_v28, 0.0 }
 0x451   : > { %503 = vadd.xlane.f32.xlu1 %v502_v29 }
 0x454   : > { %v602_v30 = vpop.xlane.xlu2 %601 }
 0x455   : > { %v603_v31 = vsub.f32 %v596_v17, %v602_v30  ;;  %v676_v32 = vpop.f32.mrf.mxu2 }
 0x456   : > { %v680_v33 = vsel %vm420_vm5, %v676_v32, -inf }
 0x457   : > { %v604_v34 = vmul.f32 1.442695, %v603_v31  ;;  %681 = vmax.xlane.f32.xlu0 %v680_v33  ;;  %v1522_v31 = vld [vmem:[%s2115_s4 + $0x28] sm:$0xff] }
 0x458   : > { %818 = vrot.lane.b32.xlu2 %v1522_v31, %s1712_s16 }
 0x459   : > { %1618 = vpow2.f32 %v604_v34  ;;  %v1521_v34 = vld [vmem:[%s2115_s4 + $0x20] sm:$0xff] }
 0x45c   : > { %v693_v35 = vpop.permute.xlu2 %692 }
 0x45d   : > { %v698_v36 = vsel %vm455_vm4, %v693_v35, 0  ;;  %v678_v37 = vpop.f32.mrf.mxu2 }
 0x45e   : > { %707 = vmatpush.bf16.msrb.mxu3 %v698_v36 }
 0x45f   : > { %v1619_v38 = vpop.eup %1618 }
 0x460   : > { %v606_v39 = vsel %vm420_vm5, %v1619_v38, 0.0 }
 0x461   : > { %607 = vadd.xlane.f32.xlu0 %v606_v39 }
 0x464   : > { %v535_v60 = vpop.permute.xlu2 %534 }
 0x465   : > { %v540_v61 = vsel %vm455_vm4, %v535_v60, 0 }
 0x466   : > { %549 = vmatpush.bf16.msrb.mxu1 %v540_v61  ;;  %v1601_v61 = vld [vmem:[%s2116_s5 + $0xc] ss:$0 sm:$0xff] }
 0x46a   : > { %511 = vrot.lane.b32.xlu1 %v510_v21, %s1716_s29 }
 0x46c   : > { %v716_v15 = vpop.permute.xlu2 %715 }
 0x46d   : > { %v721_v5 = vsel %vm455_vm4, %v716_v15, 0 }
 0x475   : > { %612 = vrot.lane.b32.xlu0 %v510_v21, %s1718_s12 }
 0x47d   : > { %635 = vrot.lane.b32.xlu0 %v634_v46, %s1712_s16  ;;  %v1940_v46 = vld [vmem:[%s294_s11] sm:$0xff] }
 0x4c4   : > { %v504_v45 = vpop.xlane.xlu1 %503 }
 0x4ca   : > { %v682_v40 = vpop.xlane.xlu0 %681 }
 0x4cb   : > { %v683_v41 = vsub.f32 %v676_v32, %v682_v40 }
 0x4cd   : > { %v684_v44 = vmul.f32 1.442695, %v683_v41 }
 0x4cf   : > { %1620 = vpow2.f32 %v684_v44 }
 0x4d0   : > { %1622 = vrcp.f32 %v504_v45 }
 0x4d4   : > { %v608_v7 = vpop.xlane.xlu0 %607 }
 0x4d5   : > { %v1621_v48 = vpop.eup %1620  ;;  %1624 = vrcp.f32 %v608_v7 }
 0x4d6   : > { %v686_v49 = vsel %vm420_vm5, %v1621_v48, 0.0  ;;  %v1623_v50 = vpop.eup %1622 }
 0x4d7   : > { %687 = vadd.xlane.f32.xlu1 %v686_v49  ;;  %v506_v51 = vmul.f32 %v1623_v50, %v1617_v28  ;;  %v309_v49 = vld [vmem:[%s303_s15] sm:$0xff]  ;;  %v310_v50 = vld [vmem:[%s303_s15 + $0x8] sm:$0xff] }
 0x4d9   : > { %v507_v54 = vpack.c.bf16 %v506_v51, %v506_v51 }
 0x4db   : > { %v1625_v56 = vpop.eup %1624 }
 0x4dc   : > { %v512_v52 = vpop.permute.xlu1 %511  ;;  %v610_v58 = vmul.f32 %v1625_v56, %v1619_v38  ;;  %v1600_v56 = vld [vmem:[%s2116_s5 + $0xb] ss:$0 sm:$0xff] }
 0x4dd   : > { %v517_v53 = vsel %vm455_vm4, %v512_v52, 0  ;;  %v811_v52 = vadd.f32 %v309_v49, %v1940_v46 }
 0x4de   : > { %526 = vmatpush.bf16.msrb.mxu0 %v517_v53  ;;  %v611_v59 = vpack.c.bf16 %v610_v58, %v610_v58 }
 0x4e1   : > { %1455 = vmatmul.msk.bf16.vlgmr.msrb.gmra.mxu0 %vm420_vm5, %v507_v54 }
 0x4e7   : > { %v613_v55 = vpop.permute.xlu0 %612 }
 0x4e8   : > { %v618_v57 = vsel %vm455_vm4, %v613_v55, 0 }
 0x4e9   : > { %627 = vmatpush.bf16.msra.mxu0 %v618_v57 }
 0x4ed   : > { %730 = vmatpush.bf16.msrb.mxu0 %v721_v5 }
 0x4ef   : > { %v636_v62 = vpop.permute.xlu0 %635 }
 0x4f0   : > { %v641_v63 = vsel %vm455_vm4, %v636_v62, 0 }
 0x4f1   : > { %1459 = vmatmul.msk.bf16.vlgmr.msra.gmra.mxu0 %vm420_vm5, %v611_v59  ;;  %650 = vmatpush.bf16.msra.mxu1 %v641_v63 }
 0x54a   : > { %v688_v1 = vpop.xlane.xlu1 %687 }
 0x54b   : > { %1626 = vrcp.f32 %v688_v1 }
 0x551   : > { %v1627_v2 = vpop.eup %1626 }
 0x552   : > { %v690_v4 = vmul.f32 %v1627_v2, %v1621_v48  ;;  %v1942_v48 = vld [vmem:[%s294_s11 + $0x8] sm:$0xff] }
 0x553   : > { %v812_v53 = vadd.f32 %v310_v50, %v1942_v48 }
 0x554   : > { %v691_v6 = vpack.c.bf16 %v690_v4, %v690_v4  ;;  %v1602_v4 = vld [vmem:[%s2116_s5 + $0x4] ss:$0 sm:$0xff] }
 0x555   : > { %v813_v59 = vpack.c.bf16 %v812_v53, %v811_v52 }
 0x556   : > { %1462 = vmatmul.msk.bf16.vlgmr.msrb.gmra.mxu3 %vm420_vm5, %v691_v6 }
 0x55e   : > { %v528_v9 = vpop.f32.mrf.mxu0 }
 0x55f   : > { %v532_v10 = vpack.c.bf16 %v528_v9, %v528_v9  ;;  %v1603_v9 = vld [vmem:[%s2116_s5 + $0x3] ss:$0 sm:$0xff] }
 0x561   : > { %1456 = vmatmul.msk.bf16.vlgmr.msrb.gmra.mxu1 %vm420_vm5, %v532_v10 }
 0x562   : > { %804 = vmatpush.bf16.msrb.mxu1 %v1522_v31  ;;  %v1981_v31 = vld [vmem:[%s2115_s4 + $0x30] sm:$0xff]  }
 0x566   : > { %v530_v11 = vpop.f32.mrf.mxu0  ;;  %805 = vmatpush.bf16.msrb.mxu1 %v1521_v34 }
 0x56e   : > { %v629_v12 = vpop.f32.mrf.mxu0 }
 0x56f   : > { %v633_v13 = vpack.c.bf16 %v629_v12, %v629_v12 }
 0x571   : > { %1460 = vmatmul.msk.bf16.vlgmr.msra.gmra.mxu1 %vm420_vm5, %v633_v13 }
 0x576   : > { %v631_v14 = vpop.f32.mrf.mxu0 }
 0x5d9   : > { %v709_v16 = vpop.f32.mrf.mxu3 }
 0x5da   : > { %v713_v17 = vpack.c.bf16 %v709_v16, %v709_v16 }
 0x5dc   : > { %1463 = vmatmul.msk.bf16.vlgmr.msrb.gmra.mxu0 %vm420_vm5, %v713_v17 }
 0x5de   : > { %v551_v18 = vpop.f32.mrf.mxu1 }
 0x5df   : > { %v574_v21 = vadd.f32 %v1887_v24, %v551_v18 }
 0x5e1   : > { %v711_v19 = vpop.f32.mrf.mxu3 }
 0x5e6   : > { %v553_v20 = vpop.f32.mrf.mxu1 }
 0x5ee   : > { %v652_v22 = vpop.f32.mrf.mxu1 }
 0x5ef   : > { %v656_v23 = vadd.f32 %v652_v22, %v574_v21 }
 0x5f6   : > { %v654_v25 = vpop.f32.mrf.mxu1 }
 0x659   : > { %v732_v28 = vpop.f32.mrf.mxu0 }
 0x65a   : > { %v736_v29 = vadd.f32 %v732_v28, %v656_v23 }
 0x65c   : > { %v739_v30 = vadd.f32 %v1599_v26, %v736_v29 }
 0x65e   : > { %v1921_v32 = vadd.f32 %v739_v30, %v1812_v0  ;;  %v819_v0 = vpop.permute.xlu2 %818  ;;  %v1975_v30 = vld [vmem:[%s2115_s4 + $0x38] sm:$0xff]  }
 0x65f   : > { %831 = vmatpush.bf16.msrb.mxu2 %v819_v0  ;;  %863 = vmatpush.bf16.msra.mxu3 %v1975_v30 }
 0x660   : > { %v743_v24 = vsel %vm313_vm0, %v1921_v32, 0.0  ;;  %v746_v33 = vmul.f32 %v1921_v32, %v1921_v32 }
 0x661   : > { %v734_v35 = vpop.f32.mrf.mxu0  ;;  %744 = vadd.xlane.f32.xlu0 %v743_v24  ;;  %v839_v24 = vpack.c.bf16 %v1942_v48, %v1940_v46 }
 0x662   : > { %v747_v36 = vsel %vm313_vm0, %v746_v33, 0.0 }
 0x663   : > { %748 = vadd.xlane.f32.xlu1 %v747_v36  ;;  %864 = vmatpush.bf16.msra.mxu3 %v1981_v31 }
 0x666   : > { %1474 = vmatmul.msk.bf16.vlgmr.msra.gmra.mxu3 %vm313_vm0, %v839_v24 }
 0x67c   : > { %816 = vrot.lane.b32.xlu1 %v1521_v34, %s1712_s16  ;;  %v1539_v34 = vunpack.c.l.b16 %v1981_v31 }
 0x67e   : > { %v1016_v35 = vpack.c.b16 %v1539_v34, %v1539_v34 }
 0x6d4   : > { %v745_v37 = vpop.xlane.xlu0 %744 }
 0x6d5   : > { %v750_v38 = vmul.f32 0.03125, %v745_v37 }
 0x6d6   : > { %v749_v39 = vpop.xlane.xlu1 %748 }
 0x6d7   : > { %v752_v40 = vmul.f32 %v750_v38, %v750_v38  ;;  %v751_v41 = vmul.f32 0.03125, %v749_v39  ;;  %v754_v55 = vsub.f32 %v1921_v32, %v750_v38 }
 0x6d9   : > { %v753_v42 = vsub.f32 %v751_v41, %v752_v40 }
 0x6db   : > { %v755_v43 = vadd.f32 1e-05, %v753_v42 }
 0x6dd   : > { %1628 = vrsqrt.f32 %v755_v43  ;;  %vm762_vm7 = vweird.f32 %v755_v43 }
 0x6e3   : > { %v1629_v44 = vpop.eup %1628 }
 0x6e4   : > { %v757_v45 = vmul.f32 %v1629_v44, %v755_v43  ;;  %vm763_vm6 = vweird.f32 %v1629_v44  ;;  %v1604_v43 = vld [vmem:[%s2116_s5 + $0x5] ss:$0 sm:$0xff] }
 0x6e5   : > { %vm764_vm8 = vmor %vm762_vm7, %vm763_vm6 }
 0x6e6   : > { %v758_v47 = vmul.f32 %v1629_v44, %v757_v45 }
 0x6e8   : > { %v759_v51 = vmul.f32 0.5, %v758_v47 }
 0x6ea   : > { %v760_v7 = vsub.f32 1.5, %v759_v51 }
 0x6ec   : > { %v761_v54 = vmul.f32 %v1629_v44, %v760_v7 }
 0x6ee   : > { %v765_v57 = vsel %vm764_vm8, %v1629_v44, %v761_v54  ;;  %v817_v58 = vpop.permute.xlu1 %816  ;;  %v866_v44 = vpop.f32.mrf.mxu3 }
 0x6ef   : > { %v766_v60 = vmul.f32 %v765_v57, %v754_v55  ;;  %832 = vmatpush.bf16.msrb.mxu2 %v817_v58  ;;  %v867_v45 = vadd.f32 %v1604_v43, %v866_v44 }
 0x6f1   : > { %v768_v62 = vmul.f32 %v1600_v56, %v766_v60  ;;  %v874_v46 = vpack.c.bf16 %v867_v45, %v867_v45 }
 0x6f2   : > { %1473 = vmatmul.msk.bf16.vlgmr.msrb.gmra.mxu2 %vm313_vm0, %v813_v59 }
 0x6f3   : > { %v770_v63 = vadd.f32 %v1601_v61, %v768_v62  ;;  %v915_v49 = vunpack.c.l.b16 %v874_v46 }
 0x6f5   : > { %v779_v1 = vadd.f32 %v770_v63, %v1849_v27 }
 0x6f6   : > { %v868_v47 = vpop.f32.mrf.mxu3 }
 0x6f7   : > { %v780_v2 = vpack.c.bf16 %v779_v1, %v779_v1  ;;  %v869_v48 = vadd.f32 %v1604_v43, %v868_v47 }
 0x6f9   : > { %1472 = vmatmul.msk.bf16.vlgmr.msrb.gmra.mxu1 %vm313_vm0, %v780_v2  ;;  %v875_v50 = vpack.c.bf16 %v869_v48, %v869_v48 }
 0x6fb   : > { %v916_v51 = vunpack.c.l.b16 %v875_v50 }
 0x6fd   : > { %v1997_v7 = vpack.c.b16 %v916_v51, %v915_v49 }
 0x6ff   : > { %929 = vmatpush.bf16.msra.mxu1 %v1997_v7 }
 0x775   : > { %v834_v3 = vpop.f32.mrf.mxu2 }
 0x776   : > { %v807_v6 = vpop.f32.mrf.mxu1  ;;  %v835_v8 = vadd.f32 %v1602_v4, %v834_v3 }
 0x777   : > { %v808_v14 = vadd.f32 %v1603_v9, %v807_v6 }
 0x778   : > { %v872_v11 = vpack.c.bf16 %v835_v8, %v835_v8 }
 0x779   : > { %v871_v16 = vpack.c.bf16 %v808_v14, %v808_v14 }
 0x77a   : > { %v878_v15 = vunpack.c.l.b16 %v872_v11 }
 0x77b   : > { %v937_v19 = vunpack.c.l.b16 %v871_v16 }
 0x77d   : > { %v836_v10 = vpop.f32.mrf.mxu2  ;;  %v938_v20 = vpack.c.b16 %v937_v19, %v937_v19 }
 0x77e   : > { %v837_v12 = vadd.f32 %v1602_v4, %v836_v10  ;;  %v809_v13 = vpop.f32.mrf.mxu1 }
 0x780   : > { %v873_v27 = vpack.c.bf16 %v837_v12, %v837_v12 }
 0x782   : > { %v879_v5 = vunpack.c.l.b16 %v873_v27 }
 0x784   : > { %v880_v17 = vpack.c.b16 %v879_v5, %v878_v15 }
 0x786   : > { %941 = vrot.lane.b32.xlu0 %v880_v17, %s1716_s29  ;;  %v885_v18 = vsel %vm420_vm5, %v880_v17, 0 }
 0x787   : > { %894 = vmatpush.bf16.xpose.msra.mxu0 %v885_v18 }
 0x78e   : > { %939 = vrot.lane.b32.xlu0 %v938_v20, %s1716_s29  ;;  %1475 = vmatmul.msk.bf16.vlgmr.msra.gmra.mxu0 %vm420_vm5, %v871_v16 }
 0x796   : > { %1040 = vrot.lane.b32.xlu0 %v880_v17, %s1718_s12 }
 0x79e   : > { %1118 = vrot.lane.b32.xlu0 %v880_v17, %s1714_s26 }
 0x7f8   : > { %v942_v21 = vpop.permute.xlu0 %941 }
 0x7f9   : > { %v947_v22 = vsel %vm420_vm5, %v942_v21, 0 }
 0x7fa   : > { %956 = vmatpush.bf16.xpose.msra.mxu2 %v947_v22 }
 0x800   : > { %v940_v23 = vpop.permute.xlu0 %939 }
 0x801   : > { %1477 = vmatmul.msk.bf16.vlgmr.msra.gmra.mxu2 %vm420_vm5, %v940_v23 }
 0x808   : > { %v1041_v25 = vpop.permute.xlu0 %1040 }
 0x809   : > { %v1046_v26 = vsel %vm420_vm5, %v1041_v25, 0  ;;  %v1540_v25 = vunpack.c.h.b16 %v1981_v31 }
 0x80a   : > { %1055 = vmatpush.bf16.xpose.msrb.mxu2 %v1046_v26 }
 0x80b   : > { %v896_v28 = vpop.f32.mrf.mxu0 }
 0x80c   : > { %v901_v29 = vsel %vm900_vm9, %v896_v28, -inf }
 0x80d   : > { %902 = vmax.xlane.f32.xlu2 %v901_v29  ;;  %v994_v29 = vpack.c.b16 %v1540_v25, %v1540_v25 }
 0x810   : > { %v1119_v54 = vpop.permute.xlu0 %1118 }
 0x811   : > { %v1124_v1 = vsel %vm420_vm5, %v1119_v54, 0 }
 0x813   : > { %v898_v33 = vpop.f32.mrf.mxu0 }
 0x825   : > { %1017 = vrot.lane.b32.xlu2 %v1016_v35, %s1712_s16 }
 0x82d   : > { %1116 = vrot.lane.b32.xlu2 %v938_v20, %s1714_s26 }
 0x880   : > { %v903_v36 = vpop.xlane.xlu2 %902 }
 0x881   : > { %v904_v0 = vsub.f32 %v896_v28, %v903_v36 }
 0x883   : > { %v905_v37 = vmul.f32 1.442695, %v904_v0 }
 0x884   : > { %v958_v38 = vpop.f32.mrf.mxu2 }
 0x885   : > { %1630 = vpow2.f32 %v905_v37  ;;  %v962_v39 = vsel %vm900_vm9, %v958_v38, -inf  ;;  %v1544_v37 = vunpack.c.h.b16 %v1975_v30 }
 0x886   : > { %963 = vmax.xlane.f32.xlu0 %v962_v39 }
 0x887   : > { %v1171_v39 = vpack.c.b16 %v1544_v37, %v1544_v37 }
 0x888   : > { %v1018_v52 = vpop.permute.xlu2 %1017 }
 0x889   : > { %v1023_v53 = vsel %vm455_vm4, %v1018_v52, 0 }
 0x88a   : > { %1032 = vmatpush.bf16.msrb.mxu1 %v1023_v53 }
 0x88b   : > { %v1631_v40 = vpop.eup %1630 }
 0x88c   : > { %v960_v41 = vpop.f32.mrf.mxu2  ;;  %v907_v42 = vsel %vm900_vm9, %v1631_v40, 0.0 }
 0x88d   : > { %908 = vadd.xlane.f32.xlu1 %v907_v42 }
 0x890   : > { %v1117_v8 = vpop.permute.xlu2 %1116 }
 0x8a6   : > { %1038 = vrot.lane.b32.xlu1 %v938_v20, %s1718_s12 }
 0x8f9   : > { %v964_v55 = vpop.xlane.xlu0 %963 }
 0x8fa   : > { %v965_v56 = vsub.f32 %v958_v38, %v964_v55 }
 0x8fc   : > { %v966_v57 = vmul.f32 1.442695, %v965_v56 }
 0x8fe   : > { %1632 = vpow2.f32 %v966_v57 }
 0x900   : > { %v909_v58 = vpop.xlane.xlu1 %908 }
 0x901   : > { %1634 = vrcp.f32 %v909_v58 }
 0x904   : > { %v1633_v59 = vpop.eup %1632 }
 0x905   : > { %v968_v60 = vsel %vm900_vm9, %v1633_v59, 0.0 }
 0x906   : > { %969 = vadd.xlane.f32.xlu0 %v968_v60 }
 0x907   : > { %v1635_v61 = vpop.eup %1634 }
 0x908   : > { %v911_v62 = vmul.f32 %v1635_v61, %v1631_v40  ;;  %v1543_v40 = vunpack.c.l.b16 %v1975_v30 }
 0x90a   : > { %v912_v63 = vpack.c.bf16 %v911_v62, %v911_v62  ;;  %v1093_v41 = vpack.c.b16 %v1543_v40, %v1543_v40  ;;  %v1525_v40 = vld [vmem:[%s2115_s4 + $0x50] sm:$0xff] }
 0x90c   : > { %1476 = vmatmul.msk.bf16.vlgmr.msra.gmra.mxu1 %vm900_vm9, %v912_v63 }
 0x90d   : > { %1133 = vmatpush.bf16.xpose.msra.mxu1 %v1124_v1 }
 0x918   : > { %v1039_v2 = vpop.permute.xlu1 %1038 }
 0x919   : > { %1481 = vmatmul.msk.bf16.vlgmr.msrb.gmra.mxu2 %vm420_vm5, %v1039_v2 }
 0x979   : > { %v970_v21 = vpop.xlane.xlu0 %969 }
 0x989   : > { %v931_v3 = vpop.f32.mrf.mxu1 }
 0x98a   : > { %v935_v4 = vpack.c.bf16 %v931_v3, %v931_v3 }
 0x98c   : > { %1480 = vmatmul.msk.bf16.vlgmr.msrb.gmra.mxu1 %vm420_vm5, %v935_v4  ;;  %v1605_v4 = vld [vmem:[%s2116_s5 + $0x6] ss:$0 sm:$0xff] }
 0x991   : > { %v933_v6 = vpop.f32.mrf.mxu1 }
 0x99c   : > { %v1057_v9 = vpop.f32.mrf.mxu2  ;;  %1484 = vmatmul.msk.bf16.vlgmr.msra.gmra.mxu1 %vm420_vm5, %v1117_v8 }
 0x99d   : > { %v1061_v10 = vsel %vm900_vm9, %v1057_v9, -inf }
 0x99e   : > { %1062 = vmax.xlane.f32.xlu1 %v1061_v10 }
 0x9a4   : > { %v1059_v11 = vpop.f32.mrf.mxu2 }
 0x9b7   : > { %1151 = vrot.lane.b32.xlu1 %v1997_v7, %s1714_s26 }
 0xa09   : > { %v2009_v12 = vpop.f32.mrf.mxu1 }
 0xa11   : > { %v1063_v13 = vpop.xlane.xlu1 %1062  ;;  %v1036_v14 = vpop.f32.mrf.mxu1 }
 0xa12   : > { %v1064_v27 = vsub.f32 %v1057_v9, %v1063_v13 }
 0xa14   : > { %v1065_v15 = vmul.f32 1.442695, %v1064_v27  ;;  %v1524_v27 = vld [vmem:[%s2115_s4 + $0x48] sm:$0xff] }
 0xa16   : > { %1636 = vpow2.f32 %v1065_v15 }
 0xa17   : > { %1638 = vrcp.f32 %v970_v21  ;;  %v1527_v21 = vld [vmem:[%s2115_s4 + $0x60] sm:$0xff] }
 0xa19   : > { %v1135_v5 = vpop.f32.mrf.mxu1 }
 0xa1a   : > { %v1139_v16 = vsel %vm900_vm9, %v1135_v5, -inf }
 0xa1b   : > { %1140 = vmax.xlane.f32.xlu2 %v1139_v16 }
 0xa1c   : > { %v1637_v17 = vpop.eup %1636 }
 0xa1d   : > { %v1067_v18 = vsel %vm900_vm9, %v1637_v17, 0.0  ;;  %v1639_v26 = vpop.eup %1638 }
 0xa1e   : > { %1068 = vadd.xlane.f32.xlu0 %v1067_v18  ;;  %v972_v24 = vmul.f32 %v1639_v26, %v1633_v59 }
 0xa20   : > { %v973_v34 = vpack.c.bf16 %v972_v24, %v972_v24 }
 0xa21   : > { %v1137_v19 = vpop.f32.mrf.mxu1 }
 0xa22   : > { %v1528_v19 = vld [vmem:[%s2115_s4 + $0x68] sm:$0xff] }
 0xa23   : > { %1309 = vmatpush.bf16.msrb.mxu1 %v1528_v19 }
 0xa27   : > { %1310 = vmatpush.bf16.msrb.mxu1 %v1527_v21 }
 0xa29   : > { %v1152_v20 = vpop.permute.xlu1 %1151 }
 0xa2a   : > { %1164 = vmatpush.bf16.msra.mxu2 %v1152_v20 }
 0xa33   : > { %974 = vrot.lane.b32.xlu2 %v1997_v7, %s1716_s29 }
 0xa3b   : > { %995 = vrot.lane.b32.xlu2 %v994_v29, %s1712_s16 }
 0xa43   : > { %1172 = vrot.lane.b32.xlu2 %v1171_v39, %s1712_s16  ;;  %v1526_v39 = vld [vmem:[%s2115_s4 + $0x58] sm:$0xff] }
 0xa44   : > { %1311 = vmatpush.bf16.msrb.mxu1 %v1526_v39 }
 0xa48   : > { %1312 = vmatpush.bf16.msrb.mxu1 %v1525_v40 }
 0xa4b   : > { %1094 = vrot.lane.b32.xlu2 %v1093_v41, %s1712_s16  ;;  %v1608_v41 = vld [vmem:[%s2116_s5 + $0x7] ss:$0 sm:$0xff]  ;;  %s1335_s16 = sshll.u32 %s1331_s9, 4  ;;  %s1336_s16 = int_to_ptr.hbm [resolvable:$true] %s1335_s16 }
 0xa4c   : > { %s1662_s26 = sshra.s32 %s1336_s16, 4  ;;  %s1663_s26 = int_to_ptr.hbm [resolvable:$true] %s1662_s26 }
 0xa4d   : > { %s1664_s29 = scalar_lea.hbm %s1663_s26, 8  ;;  %p1669_p0 = scmp.lt.s32.totalorder %s1663_s26, %s2117_s6 }
 0xa4e   : > { %p1665_p11 = scmp.ne.s32.totalorder %s1663_s26, %s1664_s29  ;;  %p1670_p1 = scmp.lt.s32.totalorder %s1668_s20, %s1664_s29 }
 0xa50   : > { %p1666_p12 = pnand %p1665_p11, %p1792_p5  ;;  %p1671_p2 = por %p1670_p1, %p1669_p0 }
 0xa52   : > { %p1667_p13 = pneg %p1666_p12 }
 0xa54   : > { %p1672_p3 = pnand %p1671_p2, %p1667_p13 }
 0xa8e   : > { %v1141_v22 = vpop.xlane.xlu2 %1140 }
 0xa8f   : > { %v1142_v23 = vsub.f32 %v1135_v5, %v1141_v22 }
 0xa91   : > { %v1143_v28 = vmul.f32 1.442695, %v1142_v23  ;;  %v1069_v38 = vpop.xlane.xlu0 %1068 }
 0xa93   : > { %1640 = vpow2.f32 %v1143_v28 }
 0xa96   : > { %v975_v33 = vpop.permute.xlu2 %974 }
 0xa97   : > { %987 = vmatpush.bf16.msrb.mxu3 %v975_v33 }
 0xa99   : > { %v1641_v35 = vpop.eup %1640 }
 0xa9a   : > { %1478 = vmatmul.msk.bf16.vlgmr.msrb.gmra.mxu3 %vm900_vm9, %v973_v34  ;;  %v1145_v36 = vsel %vm900_vm9, %v1641_v35, 0.0  ;;  %v1606_v34 = vld [vmem:[%s2116_s5 + $0xd] ss:$0 sm:$0xff] }
 0xa9b   : > { %1146 = vadd.xlane.f32.xlu0 %v1145_v36 }
 0xa9e   : > { %v996_v31 = vpop.permute.xlu2 %995 }
 0xa9f   : > { %v1001_v0 = vsel %vm455_vm4, %v996_v31, 0  ;;  %v1607_v31 = vld [vmem:[%s2116_s5 + $0xe] ss:$0 sm:$0xff] }
 0xaa0   : > { %1010 = vmatpush.bf16.msrb.mxu0 %v1001_v0 }
 0xaa6   : > { %v1173_v52 = vpop.permute.xlu2 %1172 }
 0xaa7   : > { %v1178_v53 = vsel %vm455_vm4, %v1173_v52, 0 }
 0xaaf   : > { %1073 = vrot.lane.b32.xlu0 %v1997_v7, %s1718_s12  ;;  %v1095_v7 = vpop.permute.xlu2 %1094 }
 0xab0   : > { %v1100_v54 = vsel %vm455_vm4, %v1095_v7, 0 }
 0xab1   : > { %1109 = vmatpush.bf16.msra.mxu0 %v1100_v54 }
 0xb0e   : > { %v1147_v42 = vpop.xlane.xlu0 %1146 }
 0xb0f   : > { %1642 = vrcp.f32 %v1147_v42 }
 0xb10   : > { %1644 = vrcp.f32 %v1069_v38 }
 0xb15   : > { %v1643_v43 = vpop.eup %1642 }
 0xb16   : > { %v1149_v44 = vmul.f32 %v1643_v43, %v1641_v35  ;;  %v1645_v46 = vpop.eup %1644 }
 0xb17   : > { %v1071_v49 = vmul.f32 %v1645_v46, %v1637_v17 }
 0xb18   : > { %v1150_v45 = vpack.c.bf16 %v1149_v44, %v1149_v44 }
 0xb19   : > { %v1072_v30 = vpack.c.bf16 %v1071_v49, %v1071_v49 }
 0xb1a   : > { %1485 = vmatmul.msk.bf16.vlgmr.msra.gmra.mxu2 %vm900_vm9, %v1150_v45 }
 0xb1d   : > { %v989_v47 = vpop.f32.mrf.mxu3 }
 0xb1e   : > { %v993_v48 = vpack.c.bf16 %v989_v47, %v989_v47 }
 0xb20   : > { %1479 = vmatmul.msk.bf16.vlgmr.msrb.gmra.mxu0 %vm420_vm5, %v993_v48  ;;  %v1609_v48 = vld [vmem:[%s2116_s5 + $0x8] ss:$0 sm:$0xff] }
 0xb21   : > { %v1074_v50 = vpop.permute.xlu0 %1073  ;;  %1256 = vmatpush.bf16.msrb.mxu0 %v1524_v27 }
 0xb22   : > { %1086 = vmatpush.bf16.msra.mxu3 %v1074_v50 }
 0xb25   : > { %v991_v51 = vpop.f32.mrf.mxu3  ;;  %1482 = vmatmul.msk.bf16.vlgmr.msra.gmra.mxu3 %vm900_vm9, %v1072_v30 }
 0xb26   : > { %1187 = vmatpush.bf16.msrb.mxu3 %v1178_v53 }
 0xb9d   : > { %v1012_v55 = vpop.f32.mrf.mxu0  ;;  %v1166_v56 = vpop.f32.mrf.mxu2 }
 0xb9e   : > { %v1170_v57 = vpack.c.bf16 %v1166_v56, %v1166_v56  ;;  %v1035_v1 = vadd.f32 %v2009_v12, %v1012_v55 }
 0xba0   : > { %1486 = vmatmul.msk.bf16.vlgmr.msrb.gmra.mxu3 %vm420_vm5, %v1170_v57 }
 0xba5   : > { %v1014_v58 = vpop.f32.mrf.mxu0  ;;  %v1168_v59 = vpop.f32.mrf.mxu2 }
 0xba8   : > { %v1088_v60 = vpop.f32.mrf.mxu3 }
 0xba9   : > { %v1092_v61 = vpack.c.bf16 %v1088_v60, %v1088_v60 }
 0xbab   : > { %1483 = vmatmul.msk.bf16.vlgmr.msra.gmra.mxu0 %vm420_vm5, %v1092_v61 }
 0xbb0   : > { %v1090_v62 = vpop.f32.mrf.mxu3 }
 0xc23   : > { %v1189_v63 = vpop.f32.mrf.mxu3 }
 0xc28   : > { %v1111_v2 = vpop.f32.mrf.mxu0 }
 0xc29   : > { %v1115_v3 = vadd.f32 %v1111_v2, %v1035_v1 }
 0xc2b   : > { %v1193_v6 = vadd.f32 %v1189_v63, %v1115_v3  ;;  %v1191_v8 = vpop.f32.mrf.mxu3 }
 0xc2d   : > { %v1196_v9 = vadd.f32 %v1605_v4, %v1193_v6 }
 0xc2f   : > { %v2038_v10 = vadd.f32 %v1196_v9, %v1921_v32  ;;  %v1523_v32 = vld [vmem:[%s2115_s4 + $0x40] sm:$0xff] }
 0xc30   : > { %v1113_v11 = vpop.f32.mrf.mxu0  ;;  %1257 = vmatpush.bf16.msrb.mxu0 %v1523_v32 }
 0xc31   : > { %v1200_v13 = vsel %vm313_vm0, %v2038_v10, 0.0  ;;  %v1203_v14 = vmul.f32 %v2038_v10, %v2038_v10 }
 0xc32   : > { %1201 = vadd.xlane.f32.xlu1 %v1200_v13 }
 0xc33   : > { %v1204_v12 = vsel %vm313_vm0, %v1203_v14, 0.0 }
 0xc34   : > { %1205 = vadd.xlane.f32.xlu0 %v1204_v12 }
 0xca5   : > { %v1202_v15 = vpop.xlane.xlu1 %1201 }
 0xca6   : > { %v1207_v5 = vmul.f32 0.03125, %v1202_v15 }
 0xca7   : > { %v1206_v16 = vpop.xlane.xlu0 %1205 }
 0xca8   : > { %v1209_v17 = vmul.f32 %v1207_v5, %v1207_v5  ;;  %v1208_v18 = vmul.f32 0.03125, %v1206_v16  ;;  %v1211_v33 = vsub.f32 %v2038_v10, %v1207_v5 }
 0xcaa   : > { %v1210_v20 = vsub.f32 %v1208_v18, %v1209_v17 }
 0xcac   : > { %v1212_v22 = vadd.f32 1e-05, %v1210_v20 }
 0xcae   : > { %1646 = vrsqrt.f32 %v1212_v22  ;;  %vm1219_vm11 = vweird.f32 %v1212_v22 }
 0xcb4   : > { %v1647_v23 = vpop.eup %1646 }
 0xcb5   : > { %v1214_v25 = vmul.f32 %v1647_v23, %v1212_v22  ;;  %vm1220_vm10 = vweird.f32 %v1647_v23 }
 0xcb6   : > { %vm1221_vm12 = vmor %vm1219_vm11, %vm1220_vm10 }
 0xcb7   : > { %v1215_v26 = vmul.f32 %v1647_v23, %v1214_v25 }
 0xcb9   : > { %v1216_v28 = vmul.f32 0.5, %v1215_v26 }
 0xcbb   : > { %v1217_v29 = vsub.f32 1.5, %v1216_v28 }
 0xcbd   : > { %v1218_v24 = vmul.f32 %v1647_v23, %v1217_v29 }
 0xcbf   : > { %v1222_v35 = vsel %vm1221_vm12, %v1647_v23, %v1218_v24 }
 0xcc0   : > { %v1223_v36 = vmul.f32 %v1222_v35, %v1211_v33 }
 0xcc2   : > { %v1225_v0 = vmul.f32 %v1606_v34, %v1223_v36 }
 0xcc4   : > { %v1227_v37 = vadd.f32 %v1607_v31, %v1225_v0 }
 0xcc6   : > { %v1228_v38 = vpack.c.bf16 %v1227_v37, %v1227_v37 }
 0xcc8   : > { %1495 = vmatmul.msk.bf16.vlgmr.msrb.gmra.mxu0 %vm313_vm0, %v1228_v38 }
 0xd45   : > { %v1259_v42 = vpop.f32.mrf.mxu0 }
 0xd46   : > { %v1260_v43 = vadd.f32 %v1608_v41, %v1259_v42 }
 0xd48   : > { %vm1263_vm13 = vcmp.ge.f32.partialorder %v1260_v43, 0.0  ;;  %v1264_v44 = vmul.f32 0.01, %v1260_v43 }
 0xd4a   : > { %v1265_v45 = vsel %vm1263_vm13, %v1260_v43, %v1264_v44 }
 0xd4b   : > { %v1266_v46 = vpack.c.bf16 %v1265_v45, %v1265_v45 }
 0xd4d   : > { %v1261_v47 = vpop.f32.mrf.mxu0  ;;  %1512 = vmatmul.msk.bf16.vlgmr.msrb.gmra.mxu1 %vm1301_vm14, %v1266_v46 }
 0xdca   : > { %v1314_v49 = vpop.f32.mrf.mxu1 }
 0xdcb   : > { %v1315_v50 = vadd.f32 %v1609_v48, %v1314_v49 }
 0xdcd   : > { %v1318_v30 = vadd.f32 %v1315_v50, %v2038_v10 }
 0xdcf   : > { %1319 = vst.msk [vmem:[%s285_s17] sm:$0xff] %vm313_vm0, %v1318_v30 }
 0xdd0   : > { %1675 = shalt.err (!%p1672_p3)
}
 0xdd1   : > { %1549 = dma.vmem_to_hbm [thread:$0]  (%p1792_p5), %s1334_s10, 128, %s1336_s16, %s1321_s25  }
 0xdd2   : > { %v1316_v51 = vpop.f32.mrf.mxu1 }
 0xdd3 PF: > { %p1555_p4 = scmp.ge.s32.totalorder %s1710_s24, 2  ;;  %s1347_s19 = sand.u32 1, %s1698_s21  }
 0xdd4   : > { %s1348_s13 = scalar_lea.sflag [#allocation3], %s1347_s19 }
 0xdd5   : > { %p1552_p7 = pnand %p1555_p4, %p1796_p6 }
 0xdd7   : > { %p1553_p8 = pneg %p1552_p7 }
 0xdd9   : > { %1693 = dma.done.wait (%p1553_p8), %s1348_s13, 128  }
 0xdda   : > { %1695 = vsyncadd (%p1553_p8), %s1348_s13, 4294967168  ;;  %p16_p9 = scmp.ge.s32.totalorder %s1779_s27, 4   ;;  %s2120_s21 = smov %s1702_s22 }
 0xddb   : > { %s2121_s22 = smov %s1706_s23  ;;  %s2122_s23 = smov %s1790_s30 }
 0xddc   : > { %s2123_s24 = smov %s1779_s27  ;;  %18 = sbr.rel (!%p16_p9) target bundleno = 3 (0x3), region = 88 }
 0xde1   :  { %1354 = vsyncpa [#allocation3], 1 }
 0xde2   :  { %1356 = vsyncpa [#allocation3 + $0x1], 1 }

</bundles_post_ra>
